<compile_context>
chip_gen: v6e
topology: v6e:2x2x1
jax: 0.10.0
libtpu: 0.0.40
codegen_flags: <defaults>
</compile_context>

<pallas_src>
import jax
import jax.numpy as jnp
from jax.experimental import pallas as pl
from jax.experimental.pallas import tpu as pltpu


def lstm_kernel(x_ref, wih_t_ref, whh_t_ref, b_ref, wlin_ref, blin_ref, out_ref):
    """Full LSTM recurrence + output head in a single grid step.

    x_ref:     (T, In)       input sequence
    wih_t_ref: (In, 4*Hp)    input->gates weights, columns [i|f|o|g], lane-padded,
                             i/f/o columns pre-scaled by 0.5 (tanh-sigmoid fold)
    whh_t_ref: (Hp, 4*Hp)    hidden->gates weights, same layout/fold, row-padded
    b_ref:     (1, 4*Hp)     b_ih + b_hh, same layout/fold, padded lanes zero
    wlin_ref:  (out, Hp)     output head weights, lane-dense rows, zero lane-padded
    blin_ref:  (1, out)      output head bias
    out_ref:   (1, out)      sigmoid(linear(h_T))
    """
    hp = whh_t_ref.shape[0]          # padded hidden size (multiple of 128)
    seq_len = x_ref.shape[0]

    # Input projection for every timestep at once.  With input_size == 1 this
    # is a pure VPU broadcast multiply (no MXU push); generic case uses MXU.
    if x_ref.shape[1] == 1:
        xg = x_ref[...] * wih_t_ref[...] + b_ref[...]               # (T, 4*Hp)
    else:
        xg = jnp.dot(x_ref[...], wih_t_ref[...],
                     preferred_element_type=jnp.float32) + b_ref[...]

    def activate(gates):
        # i/f/o columns were pre-scaled by 0.5 on the wrapper side, so
        # sigmoid(x) == 0.5*tanh(x/2) + 0.5 == 0.5*tanh(gates_ifo) + 0.5:
        # one EUP tanh pass over the contiguous (1, 3*Hp) slice instead of
        # exp + reciprocal.  g stays a plain tanh over the trailing (1, Hp).
        sig = 0.5 * jnp.tanh(gates[:, 0:3 * hp]) + 0.5
        i_g = sig[:, 0 * hp:1 * hp]
        f_g = sig[:, 1 * hp:2 * hp]
        o_g = sig[:, 2 * hp:3 * hp]
        g_g = jnp.tanh(gates[:, 3 * hp:4 * hp])
        return i_g, f_g, o_g, g_g

    # Peeled t = 0: h == c == 0, so skip the h@whh matmul and the f*c term.
    i_g, f_g, o_g, g_g = activate(xg[0:1, :])
    c = i_g * g_g
    h = o_g * jnp.tanh(c)

    # Remaining steps, fully unrolled with static row slices of xg (vreg-
    # resident; at T=8 xg is only 4 vregs).  h/c stay register-resident.
    # TODO(synk): if seq_len grows beyond a few dozen, switch this to
    # lax.fori_loop with xg held in VMEM scratch to avoid vreg spills.
    for t in range(1, seq_len):
        gates = xg[t:t + 1, :] + jnp.dot(
            h, whh_t_ref[...], preferred_element_type=jnp.float32)   # (1, 4*Hp)
        i_g, f_g, o_g, g_g = activate(gates)
        c = f_g * c + i_g * g_g
        h = o_g * jnp.tanh(c)

    # Output head on the last hidden state.  For out==1 this is a VPU multiply
    # + XLU lane reduce (no MXU fill/drain); padded lanes of h / wlin are 0.
    if wlin_ref.shape[0] == 1:
        head = jnp.sum(h * wlin_ref[...], axis=-1, keepdims=True)     # (1, 1)
    else:
        head = jnp.dot(h, wlin_ref[...].T,
                       preferred_element_type=jnp.float32)            # (1, out)
    out_ref[...] = jax.nn.sigmoid(head + blin_ref[...])


def _prep_gates_matrix(w, hidden, hp):
    """(4H, K) PyTorch [i,f,g,o] row blocks -> (K, 4*Hp) columns [i,f,o,g],
    zero lane-padded, with i/f/o blocks pre-scaled by 0.5 (tanh-sigmoid fold)."""
    i_b, f_b, g_b, o_b = (w[k * hidden:(k + 1) * hidden].T for k in range(4))
    pad = lambda m: jnp.pad(m, ((0, 0), (0, hp - hidden)))
    return jnp.concatenate(
        [0.5 * pad(i_b), 0.5 * pad(f_b), 0.5 * pad(o_b), pad(g_b)], axis=1)


def _prep_gates_bias(b, hidden, hp):
    """(4H,) PyTorch [i,f,g,o] segments -> (1, 4*Hp) in [i,f,o,g] order,
    zero-padded, with i/f/o segments pre-scaled by 0.5."""
    i_b, f_b, g_b, o_b = (b[k * hidden:(k + 1) * hidden] for k in range(4))
    pad = lambda v: jnp.pad(v, (0, hp - hidden))
    return jnp.concatenate(
        [0.5 * pad(i_b), 0.5 * pad(f_b), 0.5 * pad(o_b), pad(g_b)]).reshape(1, 4 * hp)


def prepare_params(w_ih, w_hh, b_ih, b_hh, w_lin, b_lin):
    """One-time weight layout prep (transpose / reorder / pad / 0.5 fold).
    Do this once and reuse across calls; it is NOT on the per-call path."""
    hidden = w_hh.shape[1]
    out_size = w_lin.shape[0]
    hp = ((hidden + 127) // 128) * 128          # lane-aligned hidden (100 -> 128)

    wih_t = _prep_gates_matrix(jnp.asarray(w_ih, jnp.float32), hidden, hp)   # (In, 4Hp)
    whh_t = jnp.pad(
        _prep_gates_matrix(jnp.asarray(w_hh, jnp.float32), hidden, hp),
        ((0, hp - hidden), (0, 0)))                                          # (Hp, 4Hp)
    b = _prep_gates_bias(
        jnp.asarray(b_ih, jnp.float32) + jnp.asarray(b_hh, jnp.float32),
        hidden, hp)                                                          # (1, 4Hp)
    wlin = jnp.pad(jnp.asarray(w_lin, jnp.float32),
                   ((0, 0), (0, hp - hidden)))                               # (out, Hp)
    blin = jnp.asarray(b_lin, jnp.float32).reshape(1, out_size)              # (1, out)
    return wih_t, whh_t, b, wlin, blin


@jax.jit
def lstm_forward_prepped(x, wih_t, whh_t, b, wlin, blin):
    """x: (seq_len, input_size); params already prepped. Returns (out_size,)."""
    out_size = blin.shape[1]
    vspec = pl.BlockSpec(memory_space=pltpu.MemorySpace.VMEM)
    out = pl.pallas_call(
        lstm_kernel,
        out_shape=jax.ShapeDtypeStruct((1, out_size), jnp.float32),
        in_specs=[vspec] * 6,
        out_specs=vspec,
    )(jnp.asarray(x, jnp.float32), wih_t, whh_t, b, wlin, blin)
    return out.reshape(out_size)


def lstm_forward(x, w_ih, w_hh, b_ih, b_hh, w_lin, b_lin):
    """Convenience wrapper: prep + jitted kernel call."""
    return lstm_forward_prepped(x, *prepare_params(w_ih, w_hh, b_ih, b_hh,
                                                   w_lin, b_lin))


def lstm_ref(x, w_ih, w_hh, b_ih, b_hh, w_lin, b_lin):
    """Pure-JAX reference matching PyTorch nn.LSTM semantics (gate order i,f,g,o)."""
    hidden = w_hh.shape[1]
    h = jnp.zeros((1, hidden), jnp.float32)
    c = jnp.zeros((1, hidden), jnp.float32)
    for t in range(x.shape[0]):
        gates = x[t:t + 1] @ w_ih.T + h @ w_hh.T + b_ih + b_hh
        i_g = jax.nn.sigmoid(gates[:, :hidden])
        f_g = jax.nn.sigmoid(gates[:, hidden:2 * hidden])
        g_g = jnp.tanh(gates[:, 2 * hidden:3 * hidden])
        o_g = jax.nn.sigmoid(gates[:, 3 * hidden:])
        c = f_g * c + i_g * g_g
        h = o_g * jnp.tanh(c)
    return jax.nn.sigmoid(h @ w_lin.T + b_lin)[0]


if __name__ == "__main__":
    # Module defaults: input_size=1, hidden_layer_size=100, output_size=1.
    seq_len, input_size, hidden, out_size = 8, 1, 100, 1

    key = jax.random.PRNGKey(0)
    k_x, k1, k2, k3, k4, k5, k6 = jax.random.split(key, 7)

    # input_seq is a 1-D tensor of length seq_len (PyTorch .view(T, 1, -1)).
    input_seq = jax.random.normal(k_x, (seq_len,), jnp.float32)
    x = input_seq.reshape(seq_len, input_size)

    # Deterministic parameter init, PyTorch-style U(-1/sqrt(H), 1/sqrt(H)).
    k_lstm = 1.0 / jnp.sqrt(hidden)
    k_lin = 1.0 / jnp.sqrt(hidden)
    w_ih = jax.random.uniform(k1, (4 * hidden, input_size), jnp.float32, -k_lstm, k_lstm)
    w_hh = jax.random.uniform(k2, (4 * hidden, hidden), jnp.float32, -k_lstm, k_lstm)
    b_ih = jax.random.uniform(k3, (4 * hidden,), jnp.float32, -k_lstm, k_lstm)
    b_hh = jax.random.uniform(k4, (4 * hidden,), jnp.float32, -k_lstm, k_lstm)
    w_lin = jax.random.uniform(k5, (out_size, hidden), jnp.float32, -k_lin, k_lin)
    b_lin = jax.random.uniform(k6, (out_size,), jnp.float32, -k_lin, k_lin)

    # Weight prep once (layout, padding, 0.5 fold), reused for every call.
    params = prepare_params(w_ih, w_hh, b_ih, b_hh, w_lin, b_lin)
    params = jax.block_until_ready(params)

    pred = lstm_forward_prepped(x, *params)
    jax.block_until_ready(pred)

    ref = lstm_ref(x, w_ih, w_hh, b_ih, b_hh, w_lin, b_lin)
    assert pred.shape == (out_size,)
    assert jnp.allclose(pred, ref, atol=1e-5, rtol=1e-5), (pred, ref)

    print("KERNEL_OK")
</pallas_src>

<mosaic_0001>
module attributes {stable_mosaic.version = 11 : i64} {
  func.func @lstm_kernel(%arg0: memref<8x1xf32, #tpu.memory_space<vmem>>, %arg1: memref<1x512xf32, #tpu.memory_space<vmem>>, %arg2: memref<128x512xf32, #tpu.memory_space<vmem>>, %arg3: memref<1x512xf32, #tpu.memory_space<vmem>>, %arg4: memref<1x128xf32, #tpu.memory_space<vmem>>, %arg5: memref<1x1xf32, #tpu.memory_space<vmem>>, %arg6: memref<1x1xf32, #tpu.memory_space<vmem>>) attributes {dimension_semantics = [], scalar_prefetch = 0 : i64, scratch_operands = 0 : i64, tpu.core_type = #tpu.core_type<tc>} {
    %c0 = arith.constant 0 : index
    %c0_0 = arith.constant 0 : index
    %0 = vector.load %arg0[%c0, %c0_0] : memref<8x1xf32, #tpu.memory_space<vmem>>, vector<8x1xf32>
    %c0_1 = arith.constant 0 : index
    %c0_2 = arith.constant 0 : index
    %1 = vector.load %arg1[%c0_1, %c0_2] : memref<1x512xf32, #tpu.memory_space<vmem>>, vector<1x512xf32>
    %2 = vector.broadcast %0 : vector<8x1xf32> to vector<8x512xf32>
    %3 = vector.broadcast %1 : vector<1x512xf32> to vector<8x512xf32>
    %4 = arith.mulf %2, %3 : vector<8x512xf32>
    %c0_3 = arith.constant 0 : index
    %c0_4 = arith.constant 0 : index
    %5 = vector.load %arg3[%c0_3, %c0_4] : memref<1x512xf32, #tpu.memory_space<vmem>>, vector<1x512xf32>
    %6 = vector.broadcast %5 : vector<1x512xf32> to vector<8x512xf32>
    %7 = arith.addf %4, %6 : vector<8x512xf32>
    %8 = vector.extract_strided_slice %7 {offsets = [0, 0], sizes = [1, 512], strides = [1, 1]} : vector<8x512xf32> to vector<1x512xf32>
    %9 = vector.extract_strided_slice %8 {offsets = [0, 0], sizes = [1, 384], strides = [1, 1]} : vector<1x512xf32> to vector<1x384xf32>
    %10 = math.tanh %9 : vector<1x384xf32>
    %cst = arith.constant 5.000000e-01 : f32
    %11 = vector.broadcast %cst : f32 to vector<1x384xf32>
    %12 = arith.mulf %11, %10 : vector<1x384xf32>
    %cst_5 = arith.constant 5.000000e-01 : f32
    %13 = vector.broadcast %cst_5 : f32 to vector<1x384xf32>
    %14 = arith.addf %12, %13 : vector<1x384xf32>
    %15 = vector.extract_strided_slice %14 {offsets = [0, 0], sizes = [1, 128], strides = [1, 1]} : vector<1x384xf32> to vector<1x128xf32>
    %16 = vector.extract_strided_slice %14 {offsets = [0, 256], sizes = [1, 128], strides = [1, 1]} : vector<1x384xf32> to vector<1x128xf32>
    %17 = vector.extract_strided_slice %8 {offsets = [0, 384], sizes = [1, 128], strides = [1, 1]} : vector<1x512xf32> to vector<1x128xf32>
    %18 = math.tanh %17 : vector<1x128xf32>
    %19 = arith.mulf %15, %18 : vector<1x128xf32>
    %20 = math.tanh %19 : vector<1x128xf32>
    %21 = arith.mulf %16, %20 : vector<1x128xf32>
    %22 = vector.extract_strided_slice %7 {offsets = [1, 0], sizes = [1, 512], strides = [1, 1]} : vector<8x512xf32> to vector<1x512xf32>
    %c0_6 = arith.constant 0 : index
    %c0_7 = arith.constant 0 : index
    %23 = vector.load %arg2[%c0_6, %c0_7] : memref<128x512xf32, #tpu.memory_space<vmem>>, vector<128x512xf32>
    %cst_8 = arith.constant dense<0.000000e+00> : vector<1x512xf32>
    %24 = tpu.matmul %21, %23, %cst_8 {dimension_numbers = #tpu.dot_dimension_numbers<[1], [0], [0], [1], [0, 0, 1, 1], [], []>} : vector<1x128xf32>, vector<128x512xf32>, vector<1x512xf32> -> vector<1x512xf32>
    %25 = arith.addf %22, %24 : vector<1x512xf32>
    %26 = vector.extract_strided_slice %25 {offsets = [0, 0], sizes = [1, 384], strides = [1, 1]} : vector<1x512xf32> to vector<1x384xf32>
    %27 = math.tanh %26 : vector<1x384xf32>
    %cst_9 = arith.constant 5.000000e-01 : f32
    %28 = vector.broadcast %cst_9 : f32 to vector<1x384xf32>
    %29 = arith.mulf %28, %27 : vector<1x384xf32>
    %cst_10 = arith.constant 5.000000e-01 : f32
    %30 = vector.broadcast %cst_10 : f32 to vector<1x384xf32>
    %31 = arith.addf %29, %30 : vector<1x384xf32>
    %32 = vector.extract_strided_slice %31 {offsets = [0, 0], sizes = [1, 128], strides = [1, 1]} : vector<1x384xf32> to vector<1x128xf32>
    %33 = vector.extract_strided_slice %31 {offsets = [0, 128], sizes = [1, 128], strides = [1, 1]} : vector<1x384xf32> to vector<1x128xf32>
    %34 = vector.extract_strided_slice %31 {offsets = [0, 256], sizes = [1, 128], strides = [1, 1]} : vector<1x384xf32> to vector<1x128xf32>
    %35 = vector.extract_strided_slice %25 {offsets = [0, 384], sizes = [1, 128], strides = [1, 1]} : vector<1x512xf32> to vector<1x128xf32>
    %36 = math.tanh %35 : vector<1x128xf32>
    %37 = arith.mulf %33, %19 : vector<1x128xf32>
    %38 = arith.mulf %32, %36 : vector<1x128xf32>
    %39 = arith.addf %37, %38 : vector<1x128xf32>
    %40 = math.tanh %39 : vector<1x128xf32>
    %41 = arith.mulf %34, %40 : vector<1x128xf32>
    %42 = vector.extract_strided_slice %7 {offsets = [2, 0], sizes = [1, 512], strides = [1, 1]} : vector<8x512xf32> to vector<1x512xf32>
    %c0_11 = arith.constant 0 : index
    %c0_12 = arith.constant 0 : index
    %43 = vector.load %arg2[%c0_11, %c0_12] : memref<128x512xf32, #tpu.memory_space<vmem>>, vector<128x512xf32>
    %cst_13 = arith.constant dense<0.000000e+00> : vector<1x512xf32>
    %44 = tpu.matmul %41, %43, %cst_13 {dimension_numbers = #tpu.dot_dimension_numbers<[1], [0], [0], [1], [0, 0, 1, 1], [], []>} : vector<1x128xf32>, vector<128x512xf32>, vector<1x512xf32> -> vector<1x512xf32>
    %45 = arith.addf %42, %44 : vector<1x512xf32>
    %46 = vector.extract_strided_slice %45 {offsets = [0, 0], sizes = [1, 384], strides = [1, 1]} : vector<1x512xf32> to vector<1x384xf32>
    %47 = math.tanh %46 : vector<1x384xf32>
    %cst_14 = arith.constant 5.000000e-01 : f32
    %48 = vector.broadcast %cst_14 : f32 to vector<1x384xf32>
    %49 = arith.mulf %48, %47 : vector<1x384xf32>
    %cst_15 = arith.constant 5.000000e-01 : f32
    %50 = vector.broadcast %cst_15 : f32 to vector<1x384xf32>
    %51 = arith.addf %49, %50 : vector<1x384xf32>
    %52 = vector.extract_strided_slice %51 {offsets = [0, 0], sizes = [1, 128], strides = [1, 1]} : vector<1x384xf32> to vector<1x128xf32>
    %53 = vector.extract_strided_slice %51 {offsets = [0, 128], sizes = [1, 128], strides = [1, 1]} : vector<1x384xf32> to vector<1x128xf32>
    %54 = vector.extract_strided_slice %51 {offsets = [0, 256], sizes = [1, 128], strides = [1, 1]} : vector<1x384xf32> to vector<1x128xf32>
    %55 = vector.extract_strided_slice %45 {offsets = [0, 384], sizes = [1, 128], strides = [1, 1]} : vector<1x512xf32> to vector<1x128xf32>
    %56 = math.tanh %55 : vector<1x128xf32>
    %57 = arith.mulf %53, %39 : vector<1x128xf32>
    %58 = arith.mulf %52, %56 : vector<1x128xf32>
    %59 = arith.addf %57, %58 : vector<1x128xf32>
    %60 = math.tanh %59 : vector<1x128xf32>
    %61 = arith.mulf %54, %60 : vector<1x128xf32>
    %62 = vector.extract_strided_slice %7 {offsets = [3, 0], sizes = [1, 512], strides = [1, 1]} : vector<8x512xf32> to vector<1x512xf32>
    %c0_16 = arith.constant 0 : index
    %c0_17 = arith.constant 0 : index
    %63 = vector.load %arg2[%c0_16, %c0_17] : memref<128x512xf32, #tpu.memory_space<vmem>>, vector<128x512xf32>
    %cst_18 = arith.constant dense<0.000000e+00> : vector<1x512xf32>
    %64 = tpu.matmul %61, %63, %cst_18 {dimension_numbers = #tpu.dot_dimension_numbers<[1], [0], [0], [1], [0, 0, 1, 1], [], []>} : vector<1x128xf32>, vector<128x512xf32>, vector<1x512xf32> -> vector<1x512xf32>
    %65 = arith.addf %62, %64 : vector<1x512xf32>
    %66 = vector.extract_strided_slice %65 {offsets = [0, 0], sizes = [1, 384], strides = [1, 1]} : vector<1x512xf32> to vector<1x384xf32>
    %67 = math.tanh %66 : vector<1x384xf32>
    %cst_19 = arith.constant 5.000000e-01 : f32
    %68 = vector.broadcast %cst_19 : f32 to vector<1x384xf32>
    %69 = arith.mulf %68, %67 : vector<1x384xf32>
    %cst_20 = arith.constant 5.000000e-01 : f32
    %70 = vector.broadcast %cst_20 : f32 to vector<1x384xf32>
    %71 = arith.addf %69, %70 : vector<1x384xf32>
    %72 = vector.extract_strided_slice %71 {offsets = [0, 0], sizes = [1, 128], strides = [1, 1]} : vector<1x384xf32> to vector<1x128xf32>
    %73 = vector.extract_strided_slice %71 {offsets = [0, 128], sizes = [1, 128], strides = [1, 1]} : vector<1x384xf32> to vector<1x128xf32>
    %74 = vector.extract_strided_slice %71 {offsets = [0, 256], sizes = [1, 128], strides = [1, 1]} : vector<1x384xf32> to vector<1x128xf32>
    %75 = vector.extract_strided_slice %65 {offsets = [0, 384], sizes = [1, 128], strides = [1, 1]} : vector<1x512xf32> to vector<1x128xf32>
    %76 = math.tanh %75 : vector<1x128xf32>
    %77 = arith.mulf %73, %59 : vector<1x128xf32>
    %78 = arith.mulf %72, %76 : vector<1x128xf32>
    %79 = arith.addf %77, %78 : vector<1x128xf32>
    %80 = math.tanh %79 : vector<1x128xf32>
    %81 = arith.mulf %74, %80 : vector<1x128xf32>
    %82 = vector.extract_strided_slice %7 {offsets = [4, 0], sizes = [1, 512], strides = [1, 1]} : vector<8x512xf32> to vector<1x512xf32>
    %c0_21 = arith.constant 0 : index
    %c0_22 = arith.constant 0 : index
    %83 = vector.load %arg2[%c0_21, %c0_22] : memref<128x512xf32, #tpu.memory_space<vmem>>, vector<128x512xf32>
    %cst_23 = arith.constant dense<0.000000e+00> : vector<1x512xf32>
    %84 = tpu.matmul %81, %83, %cst_23 {dimension_numbers = #tpu.dot_dimension_numbers<[1], [0], [0], [1], [0, 0, 1, 1], [], []>} : vector<1x128xf32>, vector<128x512xf32>, vector<1x512xf32> -> vector<1x512xf32>
    %85 = arith.addf %82, %84 : vector<1x512xf32>
    %86 = vector.extract_strided_slice %85 {offsets = [0, 0], sizes = [1, 384], strides = [1, 1]} : vector<1x512xf32> to vector<1x384xf32>
    %87 = math.tanh %86 : vector<1x384xf32>
    %cst_24 = arith.constant 5.000000e-01 : f32
    %88 = vector.broadcast %cst_24 : f32 to vector<1x384xf32>
    %89 = arith.mulf %88, %87 : vector<1x384xf32>
    %cst_25 = arith.constant 5.000000e-01 : f32
    %90 = vector.broadcast %cst_25 : f32 to vector<1x384xf32>
    %91 = arith.addf %89, %90 : vector<1x384xf32>
    %92 = vector.extract_strided_slice %91 {offsets = [0, 0], sizes = [1, 128], strides = [1, 1]} : vector<1x384xf32> to vector<1x128xf32>
    %93 = vector.extract_strided_slice %91 {offsets = [0, 128], sizes = [1, 128], strides = [1, 1]} : vector<1x384xf32> to vector<1x128xf32>
    %94 = vector.extract_strided_slice %91 {offsets = [0, 256], sizes = [1, 128], strides = [1, 1]} : vector<1x384xf32> to vector<1x128xf32>
    %95 = vector.extract_strided_slice %85 {offsets = [0, 384], sizes = [1, 128], strides = [1, 1]} : vector<1x512xf32> to vector<1x128xf32>
    %96 = math.tanh %95 : vector<1x128xf32>
    %97 = arith.mulf %93, %79 : vector<1x128xf32>
    %98 = arith.mulf %92, %96 : vector<1x128xf32>
    %99 = arith.addf %97, %98 : vector<1x128xf32>
    %100 = math.tanh %99 : vector<1x128xf32>
    %101 = arith.mulf %94, %100 : vector<1x128xf32>
    %102 = vector.extract_strided_slice %7 {offsets = [5, 0], sizes = [1, 512], strides = [1, 1]} : vector<8x512xf32> to vector<1x512xf32>
    %c0_26 = arith.constant 0 : index
    %c0_27 = arith.constant 0 : index
    %103 = vector.load %arg2[%c0_26, %c0_27] : memref<128x512xf32, #tpu.memory_space<vmem>>, vector<128x512xf32>
    %cst_28 = arith.constant dense<0.000000e+00> : vector<1x512xf32>
    %104 = tpu.matmul %101, %103, %cst_28 {dimension_numbers = #tpu.dot_dimension_numbers<[1], [0], [0], [1], [0, 0, 1, 1], [], []>} : vector<1x128xf32>, vector<128x512xf32>, vector<1x512xf32> -> vector<1x512xf32>
    %105 = arith.addf %102, %104 : vector<1x512xf32>
    %106 = vector.extract_strided_slice %105 {offsets = [0, 0], sizes = [1, 384], strides = [1, 1]} : vector<1x512xf32> to vector<1x384xf32>
    %107 = math.tanh %106 : vector<1x384xf32>
    %cst_29 = arith.constant 5.000000e-01 : f32
    %108 = vector.broadcast %cst_29 : f32 to vector<1x384xf32>
    %109 = arith.mulf %108, %107 : vector<1x384xf32>
    %cst_30 = arith.constant 5.000000e-01 : f32
    %110 = vector.broadcast %cst_30 : f32 to vector<1x384xf32>
    %111 = arith.addf %109, %110 : vector<1x384xf32>
    %112 = vector.extract_strided_slice %111 {offsets = [0, 0], sizes = [1, 128], strides = [1, 1]} : vector<1x384xf32> to vector<1x128xf32>
    %113 = vector.extract_strided_slice %111 {offsets = [0, 128], sizes = [1, 128], strides = [1, 1]} : vector<1x384xf32> to vector<1x128xf32>
    %114 = vector.extract_strided_slice %111 {offsets = [0, 256], sizes = [1, 128], strides = [1, 1]} : vector<1x384xf32> to vector<1x128xf32>
    %115 = vector.extract_strided_slice %105 {offsets = [0, 384], sizes = [1, 128], strides = [1, 1]} : vector<1x512xf32> to vector<1x128xf32>
    %116 = math.tanh %115 : vector<1x128xf32>
    %117 = arith.mulf %113, %99 : vector<1x128xf32>
    %118 = arith.mulf %112, %116 : vector<1x128xf32>
    %119 = arith.addf %117, %118 : vector<1x128xf32>
    %120 = math.tanh %119 : vector<1x128xf32>
    %121 = arith.mulf %114, %120 : vector<1x128xf32>
    %122 = vector.extract_strided_slice %7 {offsets = [6, 0], sizes = [1, 512], strides = [1, 1]} : vector<8x512xf32> to vector<1x512xf32>
    %c0_31 = arith.constant 0 : index
    %c0_32 = arith.constant 0 : index
    %123 = vector.load %arg2[%c0_31, %c0_32] : memref<128x512xf32, #tpu.memory_space<vmem>>, vector<128x512xf32>
    %cst_33 = arith.constant dense<0.000000e+00> : vector<1x512xf32>
    %124 = tpu.matmul %121, %123, %cst_33 {dimension_numbers = #tpu.dot_dimension_numbers<[1], [0], [0], [1], [0, 0, 1, 1], [], []>} : vector<1x128xf32>, vector<128x512xf32>, vector<1x512xf32> -> vector<1x512xf32>
    %125 = arith.addf %122, %124 : vector<1x512xf32>
    %126 = vector.extract_strided_slice %125 {offsets = [0, 0], sizes = [1, 384], strides = [1, 1]} : vector<1x512xf32> to vector<1x384xf32>
    %127 = math.tanh %126 : vector<1x384xf32>
    %cst_34 = arith.constant 5.000000e-01 : f32
    %128 = vector.broadcast %cst_34 : f32 to vector<1x384xf32>
    %129 = arith.mulf %128, %127 : vector<1x384xf32>
    %cst_35 = arith.constant 5.000000e-01 : f32
    %130 = vector.broadcast %cst_35 : f32 to vector<1x384xf32>
    %131 = arith.addf %129, %130 : vector<1x384xf32>
    %132 = vector.extract_strided_slice %131 {offsets = [0, 0], sizes = [1, 128], strides = [1, 1]} : vector<1x384xf32> to vector<1x128xf32>
    %133 = vector.extract_strided_slice %131 {offsets = [0, 128], sizes = [1, 128], strides = [1, 1]} : vector<1x384xf32> to vector<1x128xf32>
    %134 = vector.extract_strided_slice %131 {offsets = [0, 256], sizes = [1, 128], strides = [1, 1]} : vector<1x384xf32> to vector<1x128xf32>
    %135 = vector.extract_strided_slice %125 {offsets = [0, 384], sizes = [1, 128], strides = [1, 1]} : vector<1x512xf32> to vector<1x128xf32>
    %136 = math.tanh %135 : vector<1x128xf32>
    %137 = arith.mulf %133, %119 : vector<1x128xf32>
    %138 = arith.mulf %132, %136 : vector<1x128xf32>
    %139 = arith.addf %137, %138 : vector<1x128xf32>
    %140 = math.tanh %139 : vector<1x128xf32>
    %141 = arith.mulf %134, %140 : vector<1x128xf32>
    %142 = vector.extract_strided_slice %7 {offsets = [7, 0], sizes = [1, 512], strides = [1, 1]} : vector<8x512xf32> to vector<1x512xf32>
    %c0_36 = arith.constant 0 : index
    %c0_37 = arith.constant 0 : index
    %143 = vector.load %arg2[%c0_36, %c0_37] : memref<128x512xf32, #tpu.memory_space<vmem>>, vector<128x512xf32>
    %cst_38 = arith.constant dense<0.000000e+00> : vector<1x512xf32>
    %144 = tpu.matmul %141, %143, %cst_38 {dimension_numbers = #tpu.dot_dimension_numbers<[1], [0], [0], [1], [0, 0, 1, 1], [], []>} : vector<1x128xf32>, vector<128x512xf32>, vector<1x512xf32> -> vector<1x512xf32>
    %145 = arith.addf %142, %144 : vector<1x512xf32>
    %146 = vector.extract_strided_slice %145 {offsets = [0, 0], sizes = [1, 384], strides = [1, 1]} : vector<1x512xf32> to vector<1x384xf32>
    %147 = math.tanh %146 : vector<1x384xf32>
    %cst_39 = arith.constant 5.000000e-01 : f32
    %148 = vector.broadcast %cst_39 : f32 to vector<1x384xf32>
    %149 = arith.mulf %148, %147 : vector<1x384xf32>
    %cst_40 = arith.constant 5.000000e-01 : f32
    %150 = vector.broadcast %cst_40 : f32 to vector<1x384xf32>
    %151 = arith.addf %149, %150 : vector<1x384xf32>
    %152 = vector.extract_strided_slice %151 {offsets = [0, 0], sizes = [1, 128], strides = [1, 1]} : vector<1x384xf32> to vector<1x128xf32>
    %153 = vector.extract_strided_slice %151 {offsets = [0, 128], sizes = [1, 128], strides = [1, 1]} : vector<1x384xf32> to vector<1x128xf32>
    %154 = vector.extract_strided_slice %151 {offsets = [0, 256], sizes = [1, 128], strides = [1, 1]} : vector<1x384xf32> to vector<1x128xf32>
    %155 = vector.extract_strided_slice %145 {offsets = [0, 384], sizes = [1, 128], strides = [1, 1]} : vector<1x512xf32> to vector<1x128xf32>
    %156 = math.tanh %155 : vector<1x128xf32>
    %157 = arith.mulf %153, %139 : vector<1x128xf32>
    %158 = arith.mulf %152, %156 : vector<1x128xf32>
    %159 = arith.addf %157, %158 : vector<1x128xf32>
    %160 = math.tanh %159 : vector<1x128xf32>
    %161 = arith.mulf %154, %160 : vector<1x128xf32>
    %c0_41 = arith.constant 0 : index
    %c0_42 = arith.constant 0 : index
    %162 = vector.load %arg4[%c0_41, %c0_42] : memref<1x128xf32, #tpu.memory_space<vmem>>, vector<1x128xf32>
    %163 = arith.mulf %161, %162 : vector<1x128xf32>
    %cst_43 = arith.constant dense<0.000000e+00> : vector<1xf32>
    %164 = vector.multi_reduction <add>, %163, %cst_43 [1] : vector<1x128xf32> to vector<1xf32>
    %165 = vector.shape_cast %164 : vector<1xf32> to vector<1x1xf32>
    %c0_44 = arith.constant 0 : index
    %c0_45 = arith.constant 0 : index
    %166 = vector.load %arg5[%c0_44, %c0_45] : memref<1x1xf32, #tpu.memory_space<vmem>>, vector<1x1xf32>
    %167 = arith.addf %165, %166 : vector<1x1xf32>
    %168 = arith.negf %167 : vector<1x1xf32>
    %169 = math.exp %168 : vector<1x1xf32>
    %cst_46 = arith.constant 1.000000e+00 : f32
    %170 = vector.broadcast %cst_46 : f32 to vector<1x1xf32>
    %171 = arith.addf %170, %169 : vector<1x1xf32>
    %172 = arith.divf %170, %171 : vector<1x1xf32>
    %c0_47 = arith.constant 0 : index
    %c0_48 = arith.constant 0 : index
    %173 = vector.load %arg6[%c0_47, %c0_48] : memref<1x1xf32, #tpu.memory_space<vmem>>, vector<1x1xf32>
    tpu.vector_store %arg6[%c0_47, %c0_48], %172 {strides = array<i32>} : memref<1x1xf32, #tpu.memory_space<vmem>>, vector<1x1xf32>,
    return
  }
}

</mosaic_0001>

<bundles_post_ra>
// kernel: lstm_forward_prepped.1
= control target key start
LH: loop header
LB: loop body
LE: loop exit
PB: predicated region body
PF: predicated region fallthrough
CT: control target
= control target key end

     0   :  { %s2532_s0 = inlined_call_operand.vmem [shape: f32[8,1], index: 0, kind: input, shape index: {}]   ;;  %s2533_s1 = inlined_call_operand.vmem [shape: f32[1,512], index: 1, kind: input, shape index: {}]   ;;  %s2534_s2 = inlined_call_operand.hbm [shape: f32[128,512], index: 2, kind: input, shape index: {}]   ;;  %s2535_s3 = inlined_call_operand.vmem [shape: f32[1,512], index: 3, kind: input, shape index: {}]   ;;  %s2536_s4 = inlined_call_operand.vmem [shape: f32[1,128], index: 4, kind: input, shape index: {}]   ;;  %s2537_s5 = inlined_call_operand.<no memory space> [shape: f32[1,1], index: 5, kind: input, shape index: {}]   ;;  %s2538_s6 = inlined_call_operand.hbm [shape: f32[1,1], index: 6, kind: output, shape index: {}]  }
   0x1   :  { %v11_v0 = vstv %s2537_s5 }
   0x2   :  { %12 = vst [vmem:[#allocation2] sm:$0x1] %v11_v0 }
   0x3   :  { %13 = vsyncpa [#allocation4], 0 }
   0x4   :  { %14 = vsyncpa [#allocation5], 0  ;;  %s1665_s23 = smov [#allocation3]  }
   0x5   :  { %s24_s24 = sshll.u32 %s1665_s23, 4  ;;  %s25_s24 = int_to_ptr.vmem [resolvable:$true] %s24_s24 }
   0x6   :  { %s1629_s25 = scalar_lea.vmem %s25_s24, 8192  ;;  %p1634_p1 = scmp.lt.s32.totalorder %s25_s24, %s25_s24 }
   0x7   :  { %p1630_p0 = scmp.ne.s32.totalorder %s25_s24, %s1629_s25  ;;  %p1635_p2 = scmp.lt.s32.totalorder %s1629_s25, %s1629_s25 }
   0x9   :  { %p1636_p3 = por %p1635_p2, %p1634_p1 }
   0xb   :  { %p1637_p4 = pnand %p1636_p3, %p1630_p0 }
   0xd   :  { %1640 = shalt.err (!%p1637_p4)
}
   0xe   :  { %s1666_s26 = smov 512   ;;  %s1667_s27 = smov 32  }
   0xf   :  { %30 = dma.hbm_to_vmem [thread:$0]  %s2534_s2, 8192, %s25_s24, [#allocation4], %s1666_s26, %s1666_s26, %s1667_s27  }
  0x10   :  { %1661 = dma.done.wait [#allocation4], 8192  }
  0x11   :  { %1662 = vsyncadd [#allocation4], 4294959104  ;;  %v48_v1 = vlaneseq  ;;  %v1668_v2 = vmov 0   ;;  %v40_v5 = vld [vmem:[%s2532_s0] sm:$0xff]  ;;  %v2539_v8 = vmov 0.0   ;;  %v1733_v10 = vld [vmem:[#allocation3 + $0x1e8] sm:$0xff] }
  0x12   :  { %1474 = vset.pattern.permute.xlu0 %v1668_v2  ;;  %v1721_v6 = vld [vmem:[%s2533_s1] sm:$0xf]  ;;  %236 = vmatprep.mubr.f32.mxu0 %v2539_v8  ;;  %2609 = vst [vmem:[#allocation9_spill] sm:$0xff] %v1733_v10  ;;  %v1743_v14 = vld [vmem:[#allocation3 + $0x1f0] sm:$0xff]  ;;  %v1745_v15 = vld [vmem:[#allocation3 + $0x1c8] sm:$0xff]  ;;  %vm1430_vm0 = vcmask 1047559  }
  0x13   :  { %v1712_v3 = vshrl.u32 %v48_v1, 7  ;;  %v1726_v7 = vld [vmem:[%s2535_s3] sm:$0xf]  ;;  %307 = vmatprep.mubr.f32.mxu1 %v2539_v8  ;;  %44 = vperm.xlu0 %1474, %v40_v5   ;;  %v1753_v18 = vld [vmem:[#allocation3 + $0x1d0] sm:$0xff]  ;;  %v1755_v19 = vld [vmem:[#allocation3 + $0x1a8] sm:$0xff]  ;;  %s1670_s3 = smov [#allocation6]  }
  0x14   :  { %v1735_v11 = vld [vmem:[#allocation3 + $0x1f8] sm:$0xff]  ;;  %v1737_v12 = vld [vmem:[#allocation3 + $0x1e0] sm:$0xff]  ;;  %172 = vmatprep.subr.mxu0 %v1733_v10  ;;  %v1765_v22 = vld [vmem:[#allocation3 + $0x1b0] sm:$0xff]  ;;  %s1456_s10 = sshll.u32 %s1670_s3, 4  ;;  %vm1448_vm1 = vcmask 7175   ;;  %s1457_s10 = int_to_ptr.vmem [resolvable:$true] %s1456_s10 }
  0x15   :  { %v54_v4 = vsub.s32 1, %v1712_v3  ;;  %2610 = vst [vmem:[#allocation10_spill] sm:$0xff] %v1735_v11  ;;  %v1747_v16 = vld [vmem:[#allocation3 + $0x1d8] sm:$0xff]  ;;  %243 = vmatprep.subr.mxu1 %v1735_v11  ;;  %173 = vmatpush1.msra.mxu0 %v1737_v12  ;;  %v1751_v17 = vld [vmem:[#allocation3 + $0x1c0] sm:$0xff]  ;;  %v1767_v23 = vld [vmem:[#allocation3 + $0x188] sm:$0xff]  ;;  %s1645_s11 = scalar_lea.vmem %s1457_s10, 32  ;;  %p1646_p6 = scmp.lt.s32.totalorder %s1457_s10, %s1457_s10 }
  0x16   :  { %244 = vmatpush1.msra.mxu1 %v1743_v14  ;;  %174 = vmatprep.subr.mxu0 %v1745_v15  ;;  %v1759_v20 = vld [vmem:[#allocation3 + $0x1b8] sm:$0xff]  ;;  %v1761_v21 = vld [vmem:[#allocation3 + $0x1a0] sm:$0xff]  ;;  %v1777_v26 = vld [vmem:[#allocation3 + $0x190] sm:$0xff] }
  0x17   :  { %v1731_v9 = vrot.slane %v1721_v6, %v54_v4  ;;  %v1740_v13 = vrot.slane %v1726_v7, %v54_v4  ;;  %245 = vmatprep.subr.mxu1 %v1747_v16  ;;  %175 = vmatpush1.msra.mxu0 %v1751_v17  ;;  %v1771_v24 = vld [vmem:[#allocation3 + $0x198] sm:$0xff]  ;;  %v1773_v25 = vld [vmem:[#allocation3 + $0x180] sm:$0xff]  ;;  %v1779_v27 = vld [vmem:[#allocation3 + $0x168] sm:$0xff] }
  0x18   :  { %246 = vmatpush1.msra.mxu1 %v1753_v18  ;;  %176 = vmatprep.subr.mxu0 %v1755_v19  ;;  %v1783_v28 = vld [vmem:[#allocation3 + $0x178] sm:$0xff]  ;;  %v1785_v29 = vld [vmem:[#allocation3 + $0x160] sm:$0xff]  ;;  %v1789_v30 = vld [vmem:[#allocation3 + $0x170] sm:$0xff] }
  0x19   :  { %247 = vmatprep.subr.mxu1 %v1759_v20  ;;  %177 = vmatpush1.msra.mxu0 %v1761_v21  ;;  %v1791_v31 = vld [vmem:[#allocation3 + $0x148] sm:$0xff]  ;;  %v1795_v32 = vld [vmem:[#allocation3 + $0x158] sm:$0xff]  ;;  %v1797_v33 = vld [vmem:[#allocation3 + $0x140] sm:$0xff] }
  0x1a   :  { %248 = vmatpush1.msra.mxu1 %v1765_v22  ;;  %178 = vmatprep.subr.mxu0 %v1767_v23  ;;  %v1801_v34 = vld [vmem:[#allocation3 + $0x150] sm:$0xff]  ;;  %v1803_v35 = vld [vmem:[#allocation3 + $0x128] sm:$0xff]  ;;  %v1807_v36 = vld [vmem:[#allocation3 + $0x138] sm:$0xff] }
  0x1b   :  { %249 = vmatprep.subr.mxu1 %v1771_v24  ;;  %179 = vmatpush1.msra.mxu0 %v1773_v25  ;;  %v1809_v37 = vld [vmem:[#allocation3 + $0x120] sm:$0xff]  ;;  %v1813_v38 = vld [vmem:[#allocation3 + $0x130] sm:$0xff]  ;;  %v1815_v39 = vld [vmem:[#allocation3 + $0x108] sm:$0xff] }
  0x1c   :  { %250 = vmatpush1.msra.mxu1 %v1777_v26  ;;  %180 = vmatprep.subr.mxu0 %v1779_v27  ;;  %v1819_v40 = vld [vmem:[#allocation3 + $0x118] sm:$0xff]  ;;  %v1821_v41 = vld [vmem:[#allocation3 + $0x100] sm:$0xff]  ;;  %v1825_v42 = vld [vmem:[#allocation3 + $0x110] sm:$0xff] }
  0x1d   :  { %251 = vmatprep.subr.mxu1 %v1783_v28  ;;  %181 = vmatpush1.msra.mxu0 %v1785_v29  ;;  %v1827_v43 = vld [vmem:[#allocation3 + $0xe8] sm:$0xff]  ;;  %v1831_v44 = vld [vmem:[#allocation3 + $0xf8] sm:$0xff]  ;;  %v1833_v45 = vld [vmem:[#allocation3 + $0xe0] sm:$0xff] }
  0x1e   :  { %252 = vmatpush1.msra.mxu1 %v1789_v30  ;;  %182 = vmatprep.subr.mxu0 %v1791_v31  ;;  %v1837_v46 = vld [vmem:[#allocation3 + $0xf0] sm:$0xff]  ;;  %v1839_v47 = vld [vmem:[#allocation3 + $0xc8] sm:$0xff]  ;;  %v1843_v48 = vld [vmem:[#allocation3 + $0xd8] sm:$0xff] }
  0x1f   :  { %253 = vmatprep.subr.mxu1 %v1795_v32  ;;  %183 = vmatpush1.msra.mxu0 %v1797_v33  ;;  %v1845_v49 = vld [vmem:[#allocation3 + $0xc0] sm:$0xff]  ;;  %v1849_v50 = vld [vmem:[#allocation3 + $0xd0] sm:$0xff]  ;;  %v1851_v51 = vld [vmem:[#allocation3 + $0xa8] sm:$0xff] }
  0x20   :  { %254 = vmatpush1.msra.mxu1 %v1801_v34  ;;  %184 = vmatprep.subr.mxu0 %v1803_v35  ;;  %v1855_v52 = vld [vmem:[#allocation3 + $0xb8] sm:$0xff]  ;;  %v1857_v53 = vld [vmem:[#allocation3 + $0xa0] sm:$0xff]  ;;  %v1861_v54 = vld [vmem:[#allocation3 + $0xb0] sm:$0xff] }
  0x21   :  { %255 = vmatprep.subr.mxu1 %v1807_v36  ;;  %185 = vmatpush1.msra.mxu0 %v1809_v37  ;;  %v1863_v55 = vld [vmem:[#allocation3 + $0x88] sm:$0xff]  ;;  %v1867_v56 = vld [vmem:[#allocation3 + $0x98] sm:$0xff]  ;;  %v1869_v57 = vld [vmem:[#allocation3 + $0x80] sm:$0xff] }
  0x22   :  { %256 = vmatpush1.msra.mxu1 %v1813_v38  ;;  %186 = vmatprep.subr.mxu0 %v1815_v39  ;;  %2611 = vst [vmem:[#allocation11_spill] sm:$0xff] %v1863_v55  ;;  %2612 = vst [vmem:[#allocation12_spill] sm:$0xff] %v1867_v56  ;;  %v1873_v58 = vld [vmem:[#allocation3 + $0x90] sm:$0xff]  ;;  %v1875_v59 = vld [vmem:[#allocation3 + $0x68] sm:$0xff] }
  0x23   :  { %257 = vmatprep.subr.mxu1 %v1819_v40  ;;  %187 = vmatpush1.msra.mxu0 %v1821_v41  ;;  %2613 = vst [vmem:[#allocation13_spill] sm:$0xff] %v1869_v57  ;;  %2614 = vst [vmem:[#allocation14_spill] sm:$0xff] %v1873_v58  ;;  %v1879_v60 = vld [vmem:[#allocation3 + $0x78] sm:$0xff]  ;;  %v1881_v61 = vld [vmem:[#allocation3 + $0x60] sm:$0xff] }
  0x24   :  { %258 = vmatpush1.msra.mxu1 %v1825_v42  ;;  %188 = vmatprep.subr.mxu0 %v1827_v43  ;;  %2615 = vst [vmem:[#allocation15_spill] sm:$0xff] %v1875_v59  ;;  %2616 = vst [vmem:[#allocation16_spill] sm:$0xff] %v1879_v60  ;;  %v1885_v62 = vld [vmem:[#allocation3 + $0x70] sm:$0xff]  ;;  %v1887_v63 = vld [vmem:[#allocation3 + $0x48] sm:$0xff] }
  0x25   :  { %259 = vmatprep.subr.mxu1 %v1831_v44  ;;  %189 = vmatpush1.msra.mxu0 %v1833_v45  ;;  %2617 = vst [vmem:[#allocation17_spill] sm:$0xff] %v1881_v61  ;;  %2618 = vst [vmem:[#allocation18_spill] sm:$0xff] %v1885_v62  ;;  %v1891_v0 = vld [vmem:[#allocation3 + $0x58] sm:$0xff]  ;;  %v1893_v1 = vld [vmem:[#allocation3 + $0x40] sm:$0xff] }
  0x26   :  { %260 = vmatpush1.msra.mxu1 %v1837_v46  ;;  %190 = vmatprep.subr.mxu0 %v1839_v47  ;;  %2619 = vst [vmem:[#allocation19_spill] sm:$0xff] %v1887_v63  ;;  %2620 = vst [vmem:[#allocation20_spill] sm:$0xff] %v1891_v0  ;;  %v1897_v2 = vld [vmem:[#allocation3 + $0x50] sm:$0xff]  ;;  %v1899_v4 = vld [vmem:[#allocation3 + $0x28] sm:$0xff] }
  0x27   :  { %261 = vmatprep.subr.mxu1 %v1843_v48  ;;  %191 = vmatpush1.msra.mxu0 %v1845_v49  ;;  %2621 = vst [vmem:[#allocation21_spill] sm:$0xff] %v1893_v1  ;;  %2622 = vst [vmem:[#allocation22_spill] sm:$0xff] %v1897_v2  ;;  %v1903_v5 = vld [vmem:[#allocation3 + $0x38] sm:$0xff]  ;;  %v1905_v8 = vld [vmem:[#allocation3 + $0x20] sm:$0xff] }
  0x28   :  { %262 = vmatpush1.msra.mxu1 %v1849_v50  ;;  %192 = vmatprep.subr.mxu0 %v1851_v51  ;;  %2623 = vst [vmem:[#allocation23_spill] sm:$0xff] %v1899_v4  ;;  %2624 = vst [vmem:[#allocation24_spill] sm:$0xff] %v1903_v5 }
  0x29   :  { %263 = vmatprep.subr.mxu1 %v1855_v52  ;;  %193 = vmatpush1.msra.mxu0 %v1857_v53  ;;  %2625 = vst [vmem:[#allocation25_spill] sm:$0xff] %v1905_v8 }
  0x2a   :  { %264 = vmatpush1.msra.mxu1 %v1861_v54  ;;  %194 = vmatprep.subr.mxu0 %v1863_v55 }
  0x2b   :  { %265 = vmatprep.subr.mxu1 %v1867_v56  ;;  %195 = vmatpush1.msra.mxu0 %v1869_v57 }
  0x2c   :  { %266 = vmatpush1.msra.mxu1 %v1873_v58  ;;  %196 = vmatprep.subr.mxu0 %v1875_v59  ;;  %v1909_v59 = vld [vmem:[#allocation3 + $0x30] sm:$0xff] }
  0x2d   :  { %267 = vmatprep.subr.mxu1 %v1879_v60  ;;  %197 = vmatpush1.msra.mxu0 %v1881_v61  ;;  %2626 = vst [vmem:[#allocation26_spill] sm:$0xff] %v1909_v59  ;;  %v1911_v60 = vld [vmem:[#allocation3 + $0x8] sm:$0xff]  ;;  %v1915_v61 = vld [vmem:[#allocation3 + $0x18] sm:$0xff] }
  0x2e   :  { %268 = vmatpush1.msra.mxu1 %v1885_v62  ;;  %198 = vmatprep.subr.mxu0 %v1887_v63  ;;  %2627 = vst [vmem:[#allocation27_spill] sm:$0xff] %v1911_v60  ;;  %2628 = vst [vmem:[#allocation28_spill] sm:$0xff] %v1915_v61  ;;  %v1917_v62 = vld [vmem:[#allocation3] sm:$0xff]  ;;  %v1921_v63 = vld [vmem:[#allocation3 + $0x10] sm:$0xff] }
  0x2f   :  { %269 = vmatprep.subr.mxu1 %v1891_v0  ;;  %199 = vmatpush1.msra.mxu0 %v1893_v1  ;;  %2629 = vst [vmem:[#allocation29_spill] sm:$0xff] %v1917_v62  ;;  %2630 = vst [vmem:[#allocation30_spill] sm:$0xff] %v1921_v63 }
  0x30   :  { %270 = vmatpush1.msra.mxu1 %v1897_v2  ;;  %200 = vmatprep.subr.mxu0 %v1899_v4 }
  0x31   :  { %271 = vmatprep.subr.mxu1 %v1903_v5  ;;  %201 = vmatpush1.msra.mxu0 %v1905_v8  ;;  %v50_v5 = vsub.s32 0, %v1712_v3  ;;  %v62_v8 = vsub.s32 3, %v1712_v3 }
  0x32   :  { %272 = vmatpush1.msra.mxu1 %v1909_v59  ;;  %202 = vmatprep.subr.mxu0 %v1911_v60 }
  0x33   :  { %273 = vmatprep.subr.mxu1 %v1915_v61  ;;  %203 = vmatpush1.msra.mxu0 %v1917_v62  ;;  %v51_v4 = vrot.slane %v1721_v6, %v50_v5  ;;  %v63_v59 = vrot.slane %v1721_v6, %v62_v8  ;;  %v77_v60 = vrot.slane %v1726_v7, %v50_v5  ;;  %v58_v61 = vsub.s32 2, %v1712_v3 }
  0x34   :  { %274 = vmatpush1.msra.mxu1 %v1921_v63  ;;  %351 = vmatprep.subr.mxu0 %v1733_v10  ;;  %v89_v62 = vrot.slane %v1726_v7, %v62_v8 }
  0x35   :  { %422 = vmatprep.subr.mxu1 %v1735_v11  ;;  %v59_v58 = vrot.slane %v1721_v6, %v58_v61  ;;  %v85_v3 = vrot.slane %v1726_v7, %v58_v61  ;;  %v2632_v61 = vld [vmem:[#allocation14_spill] sm:$0xff] }
  0x8e   :  { %v45_v2 = vpop.permute.xlu0 %44 }
  0x8f   :  { %v68_v63 = vmul.f32 %v51_v4, %v45_v2  ;;  %v69_v10 = vmul.f32 %v1731_v9, %v45_v2  ;;  %v71_v1 = vmul.f32 %v63_v59, %v45_v2  ;;  %v70_v5 = vmul.f32 %v59_v58, %v45_v2  ;;  %v2631_v58 = vld [vmem:[#allocation13_spill] sm:$0xff]  ;;  %v2633_v2 = vld [vmem:[#allocation15_spill] sm:$0xff]  ;;  %v2634_v4 = vld [vmem:[#allocation16_spill] sm:$0xff] }
  0x91   :  { %v1938_v11 = vadd.f32 %v77_v60, %v68_v63  ;;  %v1941_v0 = vadd.f32 %v1740_v13, %v69_v10  ;;  %v1944_v57 = vadd.f32 %v89_v62, %v71_v1  ;;  %v1949_v8 = vadd.f32 %v85_v3, %v70_v5  ;;  %v2635_v3 = vld [vmem:[#allocation17_spill] sm:$0xff]  ;;  %v2636_v5 = vld [vmem:[#allocation18_spill] sm:$0xff] }
  0x93   :  { %1475 = vtanh.f32 %v1938_v11 }
  0x94   :  { %1477 = vtanh.f32 %v1944_v57 }
  0x95   :  { %1479 = vtanh.f32 %v1949_v8 }
  0xa0   :  { %v1476_v9 = vpop.eup %1475 }
  0xa1   :  { %v100_v59 = vmul.f32 0.5, %v1476_v9  ;;  %v1478_v10 = vpop.eup %1477  ;;  %v2637_v9 = vld [vmem:[#allocation19_spill] sm:$0xff] }
  0xa2   :  { %v1480_v6 = vpop.eup %1479 }
  0xa3   :  { %v102_v60 = vadd.f32 0.5, %v100_v59  ;;  %v101_v62 = vmul.f32 0.5, %v1480_v6  ;;  %v2638_v59 = vld [vmem:[#allocation20_spill] sm:$0xff]  ;;  %v2641_v6 = vld [vmem:[#allocation23_spill] sm:$0xff] }
  0xa5   :  { %v1952_v13 = vmul.f32 %v1478_v10, %v102_v60  ;;  %v103_v63 = vadd.f32 0.5, %v101_v62  ;;  %v2639_v60 = vld [vmem:[#allocation21_spill] sm:$0xff]  ;;  %v2640_v10 = vld [vmem:[#allocation22_spill] sm:$0xff]  ;;  %v2642_v62 = vld [vmem:[#allocation24_spill] sm:$0xff] }
  0xa7   :  { %1481 = vtanh.f32 %v1952_v13 }
  0xb4   :  { %v1482_v1 = vpop.eup %1481 }
  0xb5   :  { %v107_v7 = vmul.f32 %v1482_v1, %v103_v63  ;;  %v2643_v63 = vld [vmem:[#allocation25_spill] sm:$0xff]  ;;  %v2644_v1 = vld [vmem:[#allocation26_spill] sm:$0xff] }
  0xb7   :  { %237 = vmatmul.mubr.f32.vlgmr.msra.gmra.mxu0 %v107_v7  ;;  %308 = vmatmul.mubr.f32.vlgmr.msra.gmra.mxu1 %v107_v7  ;;  %v2645_v7 = vld [vmem:[#allocation27_spill] sm:$0xff] }
  0xb8   :  { %352 = vmatpush1.msra.mxu0 %v1737_v12  ;;  %423 = vmatpush1.msra.mxu1 %v1743_v14 }
  0xb9   :  { %353 = vmatprep.subr.mxu0 %v1745_v15  ;;  %424 = vmatprep.subr.mxu1 %v1747_v16 }
  0xba   :  { %354 = vmatpush1.msra.mxu0 %v1751_v17  ;;  %425 = vmatpush1.msra.mxu1 %v1753_v18 }
  0xbb   :  { %355 = vmatprep.subr.mxu0 %v1755_v19  ;;  %426 = vmatprep.subr.mxu1 %v1759_v20 }
  0xbc   :  { %356 = vmatpush1.msra.mxu0 %v1761_v21  ;;  %427 = vmatpush1.msra.mxu1 %v1765_v22 }
  0xbd   :  { %357 = vmatprep.subr.mxu0 %v1767_v23  ;;  %428 = vmatprep.subr.mxu1 %v1771_v24 }
  0xbe   :  { %358 = vmatpush1.msra.mxu0 %v1773_v25  ;;  %429 = vmatpush1.msra.mxu1 %v1777_v26 }
  0xbf   :  { %359 = vmatprep.subr.mxu0 %v1779_v27  ;;  %430 = vmatprep.subr.mxu1 %v1783_v28 }
  0xc0   :  { %360 = vmatpush1.msra.mxu0 %v1785_v29  ;;  %431 = vmatpush1.msra.mxu1 %v1789_v30 }
  0xc1   :  { %361 = vmatprep.subr.mxu0 %v1791_v31  ;;  %432 = vmatprep.subr.mxu1 %v1795_v32 }
  0xc2   :  { %362 = vmatpush1.msra.mxu0 %v1797_v33  ;;  %433 = vmatpush1.msra.mxu1 %v1801_v34 }
  0xc3   :  { %363 = vmatprep.subr.mxu0 %v1803_v35  ;;  %434 = vmatprep.subr.mxu1 %v1807_v36 }
  0xc4   :  { %364 = vmatpush1.msra.mxu0 %v1809_v37  ;;  %435 = vmatpush1.msra.mxu1 %v1813_v38 }
  0xc5   :  { %365 = vmatprep.subr.mxu0 %v1815_v39  ;;  %436 = vmatprep.subr.mxu1 %v1819_v40 }
  0xc6   :  { %366 = vmatpush1.msra.mxu0 %v1821_v41  ;;  %437 = vmatpush1.msra.mxu1 %v1825_v42 }
  0xc7   :  { %367 = vmatprep.subr.mxu0 %v1827_v43  ;;  %438 = vmatprep.subr.mxu1 %v1831_v44 }
  0xc8   :  { %368 = vmatpush1.msra.mxu0 %v1833_v45  ;;  %439 = vmatpush1.msra.mxu1 %v1837_v46 }
  0xc9   :  { %369 = vmatprep.subr.mxu0 %v1839_v47  ;;  %440 = vmatprep.subr.mxu1 %v1843_v48 }
  0xca   :  { %370 = vmatpush1.msra.mxu0 %v1845_v49  ;;  %441 = vmatpush1.msra.mxu1 %v1849_v50 }
  0xcb   :  { %371 = vmatprep.subr.mxu0 %v1851_v51  ;;  %442 = vmatprep.subr.mxu1 %v1855_v52 }
  0xcc   :  { %372 = vmatpush1.msra.mxu0 %v1857_v53  ;;  %443 = vmatpush1.msra.mxu1 %v1861_v54 }
  0xcd   :  { %373 = vmatprep.subr.mxu0 %v1863_v55  ;;  %444 = vmatprep.subr.mxu1 %v1867_v56 }
  0xce   :  { %374 = vmatpush1.msra.mxu0 %v2631_v58  ;;  %445 = vmatpush1.msra.mxu1 %v2632_v61 }
  0xcf   :  { %375 = vmatprep.subr.mxu0 %v2633_v2  ;;  %446 = vmatprep.subr.mxu1 %v2634_v4 }
  0xd0   :  { %376 = vmatpush1.msra.mxu0 %v2635_v3  ;;  %447 = vmatpush1.msra.mxu1 %v2636_v5  ;;  %v2646_v3 = vld [vmem:[#allocation28_spill] sm:$0xff]  ;;  %v2647_v5 = vld [vmem:[#allocation29_spill] sm:$0xff] }
  0xd1   :  { %377 = vmatprep.subr.mxu0 %v2637_v9  ;;  %448 = vmatprep.subr.mxu1 %v2638_v59  ;;  %v2648_v9 = vmov 0.0   ;;  %v2649_v59 = vld [vmem:[#allocation30_spill] sm:$0xff] }
  0xd2   :  { %378 = vmatpush1.msra.mxu0 %v2639_v60  ;;  %449 = vmatpush1.msra.mxu1 %v2640_v10  ;;  %v2650_v10 = vld [vmem:[#allocation9_spill] sm:$0xff] }
  0xd3   :  { %379 = vmatprep.subr.mxu0 %v2641_v6  ;;  %450 = vmatprep.subr.mxu1 %v2642_v62  ;;  %v2651_v6 = vld [vmem:[#allocation10_spill] sm:$0xff] }
  0xd4   :  { %380 = vmatpush1.msra.mxu0 %v2643_v63  ;;  %451 = vmatpush1.msra.mxu1 %v2644_v1 }
  0xd5   :  { %381 = vmatprep.subr.mxu0 %v2645_v7  ;;  %452 = vmatprep.subr.mxu1 %v2646_v3 }
  0xd6   :  { %382 = vmatpush1.msra.mxu0 %v2647_v5  ;;  %415 = vmatprep.mubr.f32.mxu0 %v2648_v9 }
  0xd7   :  { %453 = vmatpush1.msra.mxu1 %v2649_v59  ;;  %486 = vmatprep.mubr.f32.mxu1 %v2648_v9 }
  0xd8   :  { %530 = vmatprep.subr.mxu0 %v2650_v10  ;;  %601 = vmatprep.subr.mxu1 %v2651_v6 }
 0x177   :  { %v238_v62 = vpop.f32.mrf.mxu0  ;;  %v309_v63 = vpop.f32.mrf.mxu1 }
 0x178   :  { %v318_v60 = vrot.slane %v238_v62, 7  ;;  %v320_v9 = vrot.slane %v309_v63, 7 }
 0x179   :  { %v240_v1 = vpop.f32.mrf.mxu0  ;;  %v311_v4 = vpop.f32.mrf.mxu1 }
 0x17a   :  { %v326_v7 = vadd.f32 %v318_v60, %v1938_v11  ;;  %v319_v3 = vrot.slane %v240_v1, 7  ;;  %v321_v2 = vrot.slane %v311_v4, 7  ;;  %v328_v10 = vadd.f32 %v320_v9, %v1949_v8 }
 0x17b   :  { %v341_v60 = vrot.slane %v1952_v13, 7  ;;  %v2654_v13 = vld [vmem:[#allocation13_spill] sm:$0xff] }
 0x17c   :  { %1483 = vtanh.f32 %v326_v7  ;;  %v327_v5 = vadd.f32 %v319_v3, %v1941_v0  ;;  %v329_v59 = vadd.f32 %v321_v2, %v1944_v57 }
 0x17e   :  { %1485 = vtanh.f32 %v327_v5 }
 0x17f   :  { %1487 = vtanh.f32 %v329_v59 }
 0x180   :  { %1489 = vtanh.f32 %v328_v10  ;;  %v2657_v10 = vld [vmem:[#allocation16_spill] sm:$0xff] }
 0x189   :  { %v1484_v6 = vpop.eup %1483 }
 0x18a   :  { %v333_v61 = vmul.f32 0.5, %v1484_v6 }
 0x18b   :  { %v1486_v58 = vpop.eup %1485 }
 0x18c   :  { %v336_v62 = vadd.f32 0.5, %v333_v61  ;;  %v334_v56 = vmul.f32 0.5, %v1486_v58  ;;  %v1488_v4 = vpop.eup %1487  ;;  %v2655_v58 = vld [vmem:[#allocation14_spill] sm:$0xff]  ;;  %v2656_v61 = vld [vmem:[#allocation15_spill] sm:$0xff] }
 0x18d   :  { %v1490_v2 = vpop.eup %1489 }
 0x18e   :  { %v337_v55 = vadd.f32 0.5, %v334_v56  ;;  %v344_v7 = vmul.f32 %v1488_v4, %v336_v62  ;;  %v335_v5 = vmul.f32 0.5, %v1490_v2  ;;  %v2653_v56 = vld [vmem:[#allocation12_spill] sm:$0xff]  ;;  %v2658_v62 = vld [vmem:[#allocation17_spill] sm:$0xff]  ;;  %v2660_v4 = vld [vmem:[#allocation19_spill] sm:$0xff] }
 0x18f   :  { %v2663_v2 = vld [vmem:[#allocation22_spill] sm:$0xff] }
 0x190   :  { %v343_v1 = vmul.f32 %v341_v60, %v337_v55  ;;  %v338_v59 = vadd.f32 0.5, %v335_v5  ;;  %v2652_v55 = vld [vmem:[#allocation11_spill] sm:$0xff]  ;;  %v2659_v60 = vld [vmem:[#allocation18_spill] sm:$0xff] }
 0x191   :  { %v2664_v5 = vld [vmem:[#allocation23_spill] sm:$0xff] }
 0x192   :  { %v2026_v3 = vadd.f32 %v344_v7, %v343_v1  ;;  %v2661_v1 = vld [vmem:[#allocation20_spill] sm:$0xff]  ;;  %v2662_v7 = vld [vmem:[#allocation21_spill] sm:$0xff] }
 0x194   :  { %1491 = vtanh.f32 %v2026_v3 }
 0x1a1   :  { %v1492_v9 = vpop.eup %1491 }
 0x1a2   :  { %v347_v63 = vmul.f32 %v1492_v9, %v338_v59  ;;  %v2665_v59 = vld [vmem:[#allocation24_spill] sm:$0xff]  ;;  %v2666_v9 = vld [vmem:[#allocation25_spill] sm:$0xff] }
 0x1a4   :  { %v349_v6 = vrot.slane %v347_v63, 1  ;;  %v2667_v63 = vld [vmem:[#allocation26_spill] sm:$0xff] }
 0x1a6   :  { %416 = vmatmul.mubr.f32.vlgmr.msra.gmra.mxu0 %v349_v6  ;;  %487 = vmatmul.mubr.f32.vlgmr.msra.gmra.mxu1 %v349_v6  ;;  %v2668_v6 = vld [vmem:[#allocation27_spill] sm:$0xff] }
 0x1a7   :  { %531 = vmatpush1.msra.mxu0 %v1737_v12  ;;  %602 = vmatpush1.msra.mxu1 %v1743_v14 }
 0x1a8   :  { %532 = vmatprep.subr.mxu0 %v1745_v15  ;;  %603 = vmatprep.subr.mxu1 %v1747_v16 }
 0x1a9   :  { %533 = vmatpush1.msra.mxu0 %v1751_v17  ;;  %604 = vmatpush1.msra.mxu1 %v1753_v18 }
 0x1aa   :  { %534 = vmatprep.subr.mxu0 %v1755_v19  ;;  %605 = vmatprep.subr.mxu1 %v1759_v20 }
 0x1ab   :  { %535 = vmatpush1.msra.mxu0 %v1761_v21  ;;  %606 = vmatpush1.msra.mxu1 %v1765_v22 }
 0x1ac   :  { %536 = vmatprep.subr.mxu0 %v1767_v23  ;;  %607 = vmatprep.subr.mxu1 %v1771_v24 }
 0x1ad   :  { %537 = vmatpush1.msra.mxu0 %v1773_v25  ;;  %608 = vmatpush1.msra.mxu1 %v1777_v26 }
 0x1ae   :  { %538 = vmatprep.subr.mxu0 %v1779_v27  ;;  %609 = vmatprep.subr.mxu1 %v1783_v28 }
 0x1af   :  { %539 = vmatpush1.msra.mxu0 %v1785_v29  ;;  %610 = vmatpush1.msra.mxu1 %v1789_v30 }
 0x1b0   :  { %540 = vmatprep.subr.mxu0 %v1791_v31  ;;  %611 = vmatprep.subr.mxu1 %v1795_v32 }
 0x1b1   :  { %541 = vmatpush1.msra.mxu0 %v1797_v33  ;;  %612 = vmatpush1.msra.mxu1 %v1801_v34 }
 0x1b2   :  { %542 = vmatprep.subr.mxu0 %v1803_v35  ;;  %613 = vmatprep.subr.mxu1 %v1807_v36 }
 0x1b3   :  { %543 = vmatpush1.msra.mxu0 %v1809_v37  ;;  %614 = vmatpush1.msra.mxu1 %v1813_v38 }
 0x1b4   :  { %544 = vmatprep.subr.mxu0 %v1815_v39  ;;  %615 = vmatprep.subr.mxu1 %v1819_v40 }
 0x1b5   :  { %545 = vmatpush1.msra.mxu0 %v1821_v41  ;;  %616 = vmatpush1.msra.mxu1 %v1825_v42 }
 0x1b6   :  { %546 = vmatprep.subr.mxu0 %v1827_v43  ;;  %617 = vmatprep.subr.mxu1 %v1831_v44 }
 0x1b7   :  { %547 = vmatpush1.msra.mxu0 %v1833_v45  ;;  %618 = vmatpush1.msra.mxu1 %v1837_v46 }
 0x1b8   :  { %548 = vmatprep.subr.mxu0 %v1839_v47  ;;  %619 = vmatprep.subr.mxu1 %v1843_v48 }
 0x1b9   :  { %549 = vmatpush1.msra.mxu0 %v1845_v49  ;;  %620 = vmatpush1.msra.mxu1 %v1849_v50 }
 0x1ba   :  { %550 = vmatprep.subr.mxu0 %v1851_v51  ;;  %621 = vmatprep.subr.mxu1 %v1855_v52 }
 0x1bb   :  { %551 = vmatpush1.msra.mxu0 %v1857_v53  ;;  %622 = vmatpush1.msra.mxu1 %v1861_v54 }
 0x1bc   :  { %552 = vmatprep.subr.mxu0 %v2652_v55  ;;  %623 = vmatprep.subr.mxu1 %v2653_v56 }
 0x1bd   :  { %553 = vmatpush1.msra.mxu0 %v2654_v13  ;;  %624 = vmatpush1.msra.mxu1 %v2655_v58 }
 0x1be   :  { %554 = vmatprep.subr.mxu0 %v2656_v61  ;;  %625 = vmatprep.subr.mxu1 %v2657_v10 }
 0x1bf   :  { %555 = vmatpush1.msra.mxu0 %v2658_v62  ;;  %626 = vmatpush1.msra.mxu1 %v2659_v60  ;;  %v2669_v62 = vld [vmem:[#allocation28_spill] sm:$0xff]  ;;  %v2670_v60 = vld [vmem:[#allocation29_spill] sm:$0xff] }
 0x1c0   :  { %556 = vmatprep.subr.mxu0 %v2660_v4  ;;  %627 = vmatprep.subr.mxu1 %v2661_v1  ;;  %v2671_v4 = vmov 0.0   ;;  %v2672_v1 = vld [vmem:[#allocation30_spill] sm:$0xff] }
 0x1c1   :  { %557 = vmatpush1.msra.mxu0 %v2662_v7  ;;  %628 = vmatpush1.msra.mxu1 %v2663_v2  ;;  %v2673_v2 = vld [vmem:[#allocation9_spill] sm:$0xff] }
 0x1c2   :  { %558 = vmatprep.subr.mxu0 %v2664_v5  ;;  %629 = vmatprep.subr.mxu1 %v2665_v59  ;;  %v2674_v5 = vld [vmem:[#allocation10_spill] sm:$0xff] }
 0x1c3   :  { %559 = vmatpush1.msra.mxu0 %v2666_v9  ;;  %630 = vmatpush1.msra.mxu1 %v2667_v63 }
 0x1c4   :  { %560 = vmatprep.subr.mxu0 %v2668_v6  ;;  %631 = vmatprep.subr.mxu1 %v2669_v62 }
 0x1c5   :  { %561 = vmatpush1.msra.mxu0 %v2670_v60  ;;  %594 = vmatprep.mubr.f32.mxu0 %v2671_v4 }
 0x1c6   :  { %632 = vmatpush1.msra.mxu1 %v2672_v1  ;;  %665 = vmatprep.mubr.f32.mxu1 %v2671_v4 }
 0x1c7   :  { %709 = vmatprep.subr.mxu0 %v2673_v2  ;;  %780 = vmatprep.subr.mxu1 %v2674_v5 }
 0x266   :  { %v417_v59 = vpop.f32.mrf.mxu0  ;;  %v488_v9 = vpop.f32.mrf.mxu1 }
 0x267   :  { %v497_v7 = vrot.slane %v417_v59, 6  ;;  %v499_v4 = vrot.slane %v488_v9, 6 }
 0x268   :  { %v419_v63 = vpop.f32.mrf.mxu0  ;;  %v490_v10 = vpop.f32.mrf.mxu1 }
 0x269   :  { %v505_v6 = vadd.f32 %v497_v7, %v1938_v11  ;;  %v498_v62 = vrot.slane %v419_v63, 6  ;;  %v500_v61 = vrot.slane %v490_v10, 6  ;;  %v507_v2 = vadd.f32 %v499_v4, %v1949_v8 }
 0x26a   :  { %v520_v7 = vrot.slane %v2026_v3, 7  ;;  %v2675_v3 = vld [vmem:[#allocation11_spill] sm:$0xff] }
 0x26b   :  { %1493 = vtanh.f32 %v505_v6  ;;  %v506_v60 = vadd.f32 %v498_v62, %v1941_v0  ;;  %v508_v1 = vadd.f32 %v500_v61, %v1944_v57 }
 0x26d   :  { %1495 = vtanh.f32 %v506_v60 }
 0x26e   :  { %1497 = vtanh.f32 %v508_v1 }
 0x26f   :  { %1499 = vtanh.f32 %v507_v2  ;;  %v2680_v2 = vld [vmem:[#allocation16_spill] sm:$0xff] }
 0x278   :  { %v1494_v5 = vpop.eup %1493 }
 0x279   :  { %v512_v58 = vmul.f32 0.5, %v1494_v5 }
 0x27a   :  { %v1496_v13 = vpop.eup %1495 }
 0x27b   :  { %v515_v59 = vadd.f32 0.5, %v512_v58  ;;  %v513_v56 = vmul.f32 0.5, %v1496_v13  ;;  %v1498_v10 = vpop.eup %1497  ;;  %v2678_v13 = vld [vmem:[#allocation14_spill] sm:$0xff]  ;;  %v2679_v58 = vld [vmem:[#allocation15_spill] sm:$0xff] }
 0x27c   :  { %v1500_v61 = vpop.eup %1499 }
 0x27d   :  { %v516_v55 = vadd.f32 0.5, %v513_v56  ;;  %v523_v6 = vmul.f32 %v1498_v10, %v515_v59  ;;  %v514_v60 = vmul.f32 0.5, %v1500_v61  ;;  %v2677_v56 = vld [vmem:[#allocation13_spill] sm:$0xff]  ;;  %v2683_v10 = vld [vmem:[#allocation19_spill] sm:$0xff]  ;;  %v2686_v61 = vld [vmem:[#allocation22_spill] sm:$0xff] }
 0x27e   :  { %v2681_v59 = vld [vmem:[#allocation17_spill] sm:$0xff] }
 0x27f   :  { %v522_v63 = vmul.f32 %v520_v7, %v516_v55  ;;  %v517_v1 = vadd.f32 0.5, %v514_v60  ;;  %v2676_v55 = vld [vmem:[#allocation12_spill] sm:$0xff]  ;;  %v2682_v7 = vld [vmem:[#allocation18_spill] sm:$0xff]  ;;  %v2687_v60 = vld [vmem:[#allocation23_spill] sm:$0xff] }
 0x281   :  { %v2100_v62 = vadd.f32 %v523_v6, %v522_v63  ;;  %v2684_v63 = vld [vmem:[#allocation20_spill] sm:$0xff]  ;;  %v2685_v6 = vld [vmem:[#allocation21_spill] sm:$0xff] }
 0x283   :  { %1501 = vtanh.f32 %v2100_v62 }
 0x290   :  { %v1502_v4 = vpop.eup %1501 }
 0x291   :  { %v526_v9 = vmul.f32 %v1502_v4, %v517_v1  ;;  %v2688_v1 = vld [vmem:[#allocation24_spill] sm:$0xff]  ;;  %v2689_v4 = vld [vmem:[#allocation25_spill] sm:$0xff] }
 0x293   :  { %v528_v5 = vrot.slane %v526_v9, 2  ;;  %v2690_v9 = vld [vmem:[#allocation26_spill] sm:$0xff] }
 0x295   :  { %595 = vmatmul.mubr.f32.vlgmr.msra.gmra.mxu0 %v528_v5  ;;  %666 = vmatmul.mubr.f32.vlgmr.msra.gmra.mxu1 %v528_v5  ;;  %v2691_v5 = vld [vmem:[#allocation27_spill] sm:$0xff] }
 0x296   :  { %710 = vmatpush1.msra.mxu0 %v1737_v12  ;;  %781 = vmatpush1.msra.mxu1 %v1743_v14 }
 0x297   :  { %711 = vmatprep.subr.mxu0 %v1745_v15  ;;  %782 = vmatprep.subr.mxu1 %v1747_v16 }
 0x298   :  { %712 = vmatpush1.msra.mxu0 %v1751_v17  ;;  %783 = vmatpush1.msra.mxu1 %v1753_v18 }
 0x299   :  { %713 = vmatprep.subr.mxu0 %v1755_v19  ;;  %784 = vmatprep.subr.mxu1 %v1759_v20 }
 0x29a   :  { %714 = vmatpush1.msra.mxu0 %v1761_v21  ;;  %785 = vmatpush1.msra.mxu1 %v1765_v22 }
 0x29b   :  { %715 = vmatprep.subr.mxu0 %v1767_v23  ;;  %786 = vmatprep.subr.mxu1 %v1771_v24 }
 0x29c   :  { %716 = vmatpush1.msra.mxu0 %v1773_v25  ;;  %787 = vmatpush1.msra.mxu1 %v1777_v26 }
 0x29d   :  { %717 = vmatprep.subr.mxu0 %v1779_v27  ;;  %788 = vmatprep.subr.mxu1 %v1783_v28 }
 0x29e   :  { %718 = vmatpush1.msra.mxu0 %v1785_v29  ;;  %789 = vmatpush1.msra.mxu1 %v1789_v30 }
 0x29f   :  { %719 = vmatprep.subr.mxu0 %v1791_v31  ;;  %790 = vmatprep.subr.mxu1 %v1795_v32 }
 0x2a0   :  { %720 = vmatpush1.msra.mxu0 %v1797_v33  ;;  %791 = vmatpush1.msra.mxu1 %v1801_v34 }
 0x2a1   :  { %721 = vmatprep.subr.mxu0 %v1803_v35  ;;  %792 = vmatprep.subr.mxu1 %v1807_v36 }
 0x2a2   :  { %722 = vmatpush1.msra.mxu0 %v1809_v37  ;;  %793 = vmatpush1.msra.mxu1 %v1813_v38 }
 0x2a3   :  { %723 = vmatprep.subr.mxu0 %v1815_v39  ;;  %794 = vmatprep.subr.mxu1 %v1819_v40 }
 0x2a4   :  { %724 = vmatpush1.msra.mxu0 %v1821_v41  ;;  %795 = vmatpush1.msra.mxu1 %v1825_v42 }
 0x2a5   :  { %725 = vmatprep.subr.mxu0 %v1827_v43  ;;  %796 = vmatprep.subr.mxu1 %v1831_v44 }
 0x2a6   :  { %726 = vmatpush1.msra.mxu0 %v1833_v45  ;;  %797 = vmatpush1.msra.mxu1 %v1837_v46 }
 0x2a7   :  { %727 = vmatprep.subr.mxu0 %v1839_v47  ;;  %798 = vmatprep.subr.mxu1 %v1843_v48 }
 0x2a8   :  { %728 = vmatpush1.msra.mxu0 %v1845_v49  ;;  %799 = vmatpush1.msra.mxu1 %v1849_v50 }
 0x2a9   :  { %729 = vmatprep.subr.mxu0 %v1851_v51  ;;  %800 = vmatprep.subr.mxu1 %v1855_v52 }
 0x2aa   :  { %730 = vmatpush1.msra.mxu0 %v1857_v53  ;;  %801 = vmatpush1.msra.mxu1 %v1861_v54 }
 0x2ab   :  { %731 = vmatprep.subr.mxu0 %v2675_v3  ;;  %802 = vmatprep.subr.mxu1 %v2676_v55 }
 0x2ac   :  { %732 = vmatpush1.msra.mxu0 %v2677_v56  ;;  %803 = vmatpush1.msra.mxu1 %v2678_v13 }
 0x2ad   :  { %733 = vmatprep.subr.mxu0 %v2679_v58  ;;  %804 = vmatprep.subr.mxu1 %v2680_v2 }
 0x2ae   :  { %734 = vmatpush1.msra.mxu0 %v2681_v59  ;;  %805 = vmatpush1.msra.mxu1 %v2682_v7  ;;  %v2692_v59 = vld [vmem:[#allocation28_spill] sm:$0xff]  ;;  %v2693_v7 = vld [vmem:[#allocation29_spill] sm:$0xff] }
 0x2af   :  { %735 = vmatprep.subr.mxu0 %v2683_v10  ;;  %806 = vmatprep.subr.mxu1 %v2684_v63  ;;  %v2694_v10 = vmov 0.0   ;;  %v2695_v63 = vld [vmem:[#allocation30_spill] sm:$0xff] }
 0x2b0   :  { %736 = vmatpush1.msra.mxu0 %v2685_v6  ;;  %807 = vmatpush1.msra.mxu1 %v2686_v61  ;;  %v2696_v61 = vld [vmem:[#allocation9_spill] sm:$0xff] }
 0x2b1   :  { %737 = vmatprep.subr.mxu0 %v2687_v60  ;;  %808 = vmatprep.subr.mxu1 %v2688_v1  ;;  %v2697_v60 = vld [vmem:[#allocation10_spill] sm:$0xff] }
 0x2b2   :  { %738 = vmatpush1.msra.mxu0 %v2689_v4  ;;  %809 = vmatpush1.msra.mxu1 %v2690_v9 }
 0x2b3   :  { %739 = vmatprep.subr.mxu0 %v2691_v5  ;;  %810 = vmatprep.subr.mxu1 %v2692_v59 }
 0x2b4   :  { %740 = vmatpush1.msra.mxu0 %v2693_v7  ;;  %773 = vmatprep.mubr.f32.mxu0 %v2694_v10 }
 0x2b5   :  { %811 = vmatpush1.msra.mxu1 %v2695_v63  ;;  %844 = vmatprep.mubr.f32.mxu1 %v2694_v10 }
 0x2b6   :  { %888 = vmatprep.subr.mxu0 %v2696_v61  ;;  %959 = vmatprep.subr.mxu1 %v2697_v60 }
 0x355   :  { %v596_v1 = vpop.f32.mrf.mxu0  ;;  %v667_v4 = vpop.f32.mrf.mxu1 }
 0x356   :  { %v676_v6 = vrot.slane %v596_v1, 5  ;;  %v678_v10 = vrot.slane %v667_v4, 5 }
 0x357   :  { %v598_v9 = vpop.f32.mrf.mxu0  ;;  %v669_v2 = vpop.f32.mrf.mxu1 }
 0x358   :  { %v684_v5 = vadd.f32 %v676_v6, %v1938_v11  ;;  %v677_v59 = vrot.slane %v598_v9, 5  ;;  %v679_v58 = vrot.slane %v669_v2, 5  ;;  %v686_v61 = vadd.f32 %v678_v10, %v1949_v8 }
 0x359   :  { %v699_v6 = vrot.slane %v2100_v62, 7 }
 0x35a   :  { %1503 = vtanh.f32 %v684_v5  ;;  %v685_v7 = vadd.f32 %v677_v59, %v1941_v0  ;;  %v687_v63 = vadd.f32 %v679_v58, %v1944_v57 }
 0x35c   :  { %1505 = vtanh.f32 %v685_v7 }
 0x35d   :  { %1507 = vtanh.f32 %v687_v63 }
 0x35e   :  { %1509 = vtanh.f32 %v686_v61 }
 0x367   :  { %v1504_v60 = vpop.eup %1503 }
 0x368   :  { %v691_v13 = vmul.f32 0.5, %v1504_v60 }
 0x369   :  { %v1506_v56 = vpop.eup %1505 }
 0x36a   :  { %v694_v1 = vadd.f32 0.5, %v691_v13  ;;  %v692_v55 = vmul.f32 0.5, %v1506_v56  ;;  %v1508_v2 = vpop.eup %1507 }
 0x36b   :  { %v1510_v58 = vpop.eup %1509 }
 0x36c   :  { %v695_v3 = vadd.f32 0.5, %v692_v55  ;;  %v702_v5 = vmul.f32 %v1508_v2, %v694_v1  ;;  %v693_v7 = vmul.f32 0.5, %v1510_v58  ;;  %v2261_v58 = vld [vmem:[#allocation3 + $0x1c8] sm:$0xff] }
 0x36e   :  { %v701_v9 = vmul.f32 %v699_v6, %v695_v3  ;;  %v696_v63 = vadd.f32 0.5, %v693_v7  ;;  %v2264_v7 = vld [vmem:[#allocation3 + $0x1d8] sm:$0xff] }
 0x370   :  { %v2174_v59 = vadd.f32 %v702_v5, %v701_v9  ;;  %v2255_v5 = vld [vmem:[#allocation3 + $0x1e0] sm:$0xff] }
 0x372   :  { %1511 = vtanh.f32 %v2174_v59 }
 0x37f   :  { %v1512_v10 = vpop.eup %1511 }
 0x380   :  { %v705_v4 = vmul.f32 %v1512_v10, %v696_v63  ;;  %v2267_v63 = vld [vmem:[#allocation3 + $0x1c0] sm:$0xff]  ;;  %v2270_v10 = vld [vmem:[#allocation3 + $0x1d0] sm:$0xff] }
 0x382   :  { %v707_v60 = vrot.slane %v705_v4, 3  ;;  %v2273_v4 = vld [vmem:[#allocation3 + $0x1a8] sm:$0xff] }
 0x384   :  { %774 = vmatmul.mubr.f32.vlgmr.msra.gmra.mxu0 %v707_v60  ;;  %845 = vmatmul.mubr.f32.vlgmr.msra.gmra.mxu1 %v707_v60  ;;  %v2276_v60 = vld [vmem:[#allocation3 + $0x1b8] sm:$0xff] }
 0x385   :  { %889 = vmatpush1.msra.mxu0 %v1737_v12  ;;  %960 = vmatpush1.msra.mxu1 %v1743_v14  ;;  %v2698_v12 = vld [vmem:[#allocation11_spill] sm:$0xff]  ;;  %v2699_v14 = vld [vmem:[#allocation12_spill] sm:$0xff] }
 0x386   :  { %890 = vmatprep.subr.mxu0 %v1745_v15  ;;  %961 = vmatprep.subr.mxu1 %v1747_v16  ;;  %v2700_v15 = vld [vmem:[#allocation13_spill] sm:$0xff]  ;;  %v2701_v16 = vld [vmem:[#allocation14_spill] sm:$0xff] }
 0x387   :  { %891 = vmatpush1.msra.mxu0 %v1751_v17  ;;  %962 = vmatpush1.msra.mxu1 %v1753_v18  ;;  %v2702_v17 = vld [vmem:[#allocation15_spill] sm:$0xff]  ;;  %v2703_v18 = vld [vmem:[#allocation16_spill] sm:$0xff] }
 0x388   :  { %892 = vmatprep.subr.mxu0 %v1755_v19  ;;  %963 = vmatprep.subr.mxu1 %v1759_v20  ;;  %v2704_v19 = vld [vmem:[#allocation17_spill] sm:$0xff]  ;;  %v2705_v20 = vld [vmem:[#allocation18_spill] sm:$0xff] }
 0x389   :  { %893 = vmatpush1.msra.mxu0 %v1761_v21  ;;  %964 = vmatpush1.msra.mxu1 %v1765_v22  ;;  %v2706_v21 = vld [vmem:[#allocation19_spill] sm:$0xff]  ;;  %v2707_v22 = vld [vmem:[#allocation20_spill] sm:$0xff] }
 0x38a   :  { %894 = vmatprep.subr.mxu0 %v1767_v23  ;;  %965 = vmatprep.subr.mxu1 %v1771_v24  ;;  %v2708_v23 = vld [vmem:[#allocation21_spill] sm:$0xff]  ;;  %v2709_v24 = vld [vmem:[#allocation22_spill] sm:$0xff] }
 0x38b   :  { %895 = vmatpush1.msra.mxu0 %v1773_v25  ;;  %966 = vmatpush1.msra.mxu1 %v1777_v26  ;;  %v2710_v25 = vld [vmem:[#allocation23_spill] sm:$0xff]  ;;  %v2711_v26 = vld [vmem:[#allocation24_spill] sm:$0xff] }
 0x38c   :  { %896 = vmatprep.subr.mxu0 %v1779_v27  ;;  %967 = vmatprep.subr.mxu1 %v1783_v28  ;;  %v2712_v27 = vld [vmem:[#allocation25_spill] sm:$0xff]  ;;  %v2713_v28 = vld [vmem:[#allocation26_spill] sm:$0xff] }
 0x38d   :  { %897 = vmatpush1.msra.mxu0 %v1785_v29  ;;  %968 = vmatpush1.msra.mxu1 %v1789_v30  ;;  %v2714_v29 = vld [vmem:[#allocation27_spill] sm:$0xff]  ;;  %v2715_v30 = vld [vmem:[#allocation28_spill] sm:$0xff] }
 0x38e   :  { %898 = vmatprep.subr.mxu0 %v1791_v31  ;;  %969 = vmatprep.subr.mxu1 %v1795_v32  ;;  %v2716_v31 = vld [vmem:[#allocation29_spill] sm:$0xff]  ;;  %v2717_v32 = vmov 0.0  }
 0x38f   :  { %899 = vmatpush1.msra.mxu0 %v1797_v33  ;;  %970 = vmatpush1.msra.mxu1 %v1801_v34  ;;  %v2718_v33 = vld [vmem:[#allocation30_spill] sm:$0xff] }
 0x390   :  { %900 = vmatprep.subr.mxu0 %v1803_v35  ;;  %971 = vmatprep.subr.mxu1 %v1807_v36  ;;  %v2241_v34 = vld [vmem:[#allocation3 + $0x1e8] sm:$0xff]  ;;  %v2244_v35 = vld [vmem:[#allocation3 + $0x1f8] sm:$0xff] }
 0x391   :  { %901 = vmatpush1.msra.mxu0 %v1809_v37  ;;  %972 = vmatpush1.msra.mxu1 %v1813_v38 }
 0x392   :  { %902 = vmatprep.subr.mxu0 %v1815_v39  ;;  %973 = vmatprep.subr.mxu1 %v1819_v40 }
 0x393   :  { %903 = vmatpush1.msra.mxu0 %v1821_v41  ;;  %974 = vmatpush1.msra.mxu1 %v1825_v42 }
 0x394   :  { %904 = vmatprep.subr.mxu0 %v1827_v43  ;;  %975 = vmatprep.subr.mxu1 %v1831_v44 }
 0x395   :  { %905 = vmatpush1.msra.mxu0 %v1833_v45  ;;  %976 = vmatpush1.msra.mxu1 %v1837_v46 }
 0x396   :  { %906 = vmatprep.subr.mxu0 %v1839_v47  ;;  %977 = vmatprep.subr.mxu1 %v1843_v48 }
 0x397   :  { %907 = vmatpush1.msra.mxu0 %v1845_v49  ;;  %978 = vmatpush1.msra.mxu1 %v1849_v50 }
 0x398   :  { %908 = vmatprep.subr.mxu0 %v1851_v51  ;;  %979 = vmatprep.subr.mxu1 %v1855_v52 }
 0x399   :  { %909 = vmatpush1.msra.mxu0 %v1857_v53  ;;  %980 = vmatpush1.msra.mxu1 %v1861_v54  ;;  %v878_v54 = vrot.slane %v2174_v59, 7  ;;  %v2258_v59 = vld [vmem:[#allocation3 + $0x1f0] sm:$0xff] }
 0x39a   :  { %910 = vmatprep.subr.mxu0 %v2698_v12  ;;  %981 = vmatprep.subr.mxu1 %v2699_v14  ;;  %v2279_v12 = vld [vmem:[#allocation3 + $0x1a0] sm:$0xff]  ;;  %v2282_v14 = vld [vmem:[#allocation3 + $0x1b0] sm:$0xff] }
 0x39b   :  { %911 = vmatpush1.msra.mxu0 %v2700_v15  ;;  %982 = vmatpush1.msra.mxu1 %v2701_v16  ;;  %v2285_v15 = vld [vmem:[#allocation3 + $0x188] sm:$0xff]  ;;  %v2288_v16 = vld [vmem:[#allocation3 + $0x198] sm:$0xff] }
 0x39c   :  { %912 = vmatprep.subr.mxu0 %v2702_v17  ;;  %983 = vmatprep.subr.mxu1 %v2703_v18  ;;  %v2291_v17 = vld [vmem:[#allocation3 + $0x180] sm:$0xff]  ;;  %v2294_v18 = vld [vmem:[#allocation3 + $0x190] sm:$0xff] }
 0x39d   :  { %913 = vmatpush1.msra.mxu0 %v2704_v19  ;;  %984 = vmatpush1.msra.mxu1 %v2705_v20  ;;  %v2297_v19 = vld [vmem:[#allocation3 + $0x168] sm:$0xff]  ;;  %v2300_v20 = vld [vmem:[#allocation3 + $0x178] sm:$0xff] }
 0x39e   :  { %914 = vmatprep.subr.mxu0 %v2706_v21  ;;  %985 = vmatprep.subr.mxu1 %v2707_v22  ;;  %v2303_v21 = vld [vmem:[#allocation3 + $0x160] sm:$0xff]  ;;  %v2306_v22 = vld [vmem:[#allocation3 + $0x170] sm:$0xff] }
 0x39f   :  { %915 = vmatpush1.msra.mxu0 %v2708_v23  ;;  %986 = vmatpush1.msra.mxu1 %v2709_v24  ;;  %v2309_v23 = vld [vmem:[#allocation3 + $0x148] sm:$0xff]  ;;  %v2312_v24 = vld [vmem:[#allocation3 + $0x158] sm:$0xff] }
 0x3a0   :  { %916 = vmatprep.subr.mxu0 %v2710_v25  ;;  %987 = vmatprep.subr.mxu1 %v2711_v26  ;;  %v2315_v25 = vld [vmem:[#allocation3 + $0x140] sm:$0xff]  ;;  %v2318_v26 = vld [vmem:[#allocation3 + $0x150] sm:$0xff] }
 0x3a1   :  { %917 = vmatpush1.msra.mxu0 %v2712_v27  ;;  %988 = vmatpush1.msra.mxu1 %v2713_v28  ;;  %v2321_v27 = vld [vmem:[#allocation3 + $0x128] sm:$0xff]  ;;  %v2324_v28 = vld [vmem:[#allocation3 + $0x138] sm:$0xff] }
 0x3a2   :  { %918 = vmatprep.subr.mxu0 %v2714_v29  ;;  %989 = vmatprep.subr.mxu1 %v2715_v30  ;;  %v2327_v29 = vld [vmem:[#allocation3 + $0x120] sm:$0xff]  ;;  %v2330_v30 = vld [vmem:[#allocation3 + $0x130] sm:$0xff] }
 0x3a3   :  { %919 = vmatpush1.msra.mxu0 %v2716_v31  ;;  %952 = vmatprep.mubr.f32.mxu0 %v2717_v32  ;;  %v2333_v31 = vld [vmem:[#allocation3 + $0x108] sm:$0xff] }
 0x3a4   :  { %990 = vmatpush1.msra.mxu1 %v2718_v33  ;;  %1023 = vmatprep.mubr.f32.mxu1 %v2717_v32  ;;  %v2336_v33 = vld [vmem:[#allocation3 + $0x118] sm:$0xff] }
 0x3a5   :  { %1067 = vmatprep.subr.mxu0 %v2241_v34  ;;  %1138 = vmatprep.subr.mxu1 %v2244_v35 }
 0x444   :  { %v775_v36 = vpop.f32.mrf.mxu0  ;;  %v846_v37 = vpop.f32.mrf.mxu1 }
 0x445   :  { %v855_v38 = vrot.slane %v775_v36, 4  ;;  %v857_v46 = vrot.slane %v846_v37, 4  ;;  %v2339_v36 = vld [vmem:[#allocation3 + $0x100] sm:$0xff]  ;;  %v2342_v37 = vld [vmem:[#allocation3 + $0x110] sm:$0xff] }
 0x446   :  { %v777_v39 = vpop.f32.mrf.mxu0  ;;  %v848_v40 = vpop.f32.mrf.mxu1 }
 0x447   :  { %v863_v41 = vadd.f32 %v855_v38, %v1938_v11  ;;  %v856_v42 = vrot.slane %v777_v39, 4  ;;  %v858_v43 = vrot.slane %v848_v40, 4  ;;  %v865_v47 = vadd.f32 %v857_v46, %v1949_v8  ;;  %v2345_v38 = vld [vmem:[#allocation3 + $0xe8] sm:$0xff]  ;;  %v2348_v39 = vld [vmem:[#allocation3 + $0xf8] sm:$0xff]  ;;  %v2351_v40 = vld [vmem:[#allocation3 + $0xe0] sm:$0xff] }
 0x448   :  { %v2369_v46 = vld [vmem:[#allocation3 + $0xa8] sm:$0xff] }
 0x449   :  { %1513 = vtanh.f32 %v863_v41  ;;  %v864_v44 = vadd.f32 %v856_v42, %v1941_v0  ;;  %v866_v45 = vadd.f32 %v858_v43, %v1944_v57  ;;  %v2354_v41 = vld [vmem:[#allocation3 + $0xf0] sm:$0xff]  ;;  %v2357_v42 = vld [vmem:[#allocation3 + $0xc8] sm:$0xff]  ;;  %v2360_v43 = vld [vmem:[#allocation3 + $0xd8] sm:$0xff] }
 0x44b   :  { %1515 = vtanh.f32 %v864_v44  ;;  %v2363_v44 = vld [vmem:[#allocation3 + $0xc0] sm:$0xff] }
 0x44c   :  { %1517 = vtanh.f32 %v866_v45  ;;  %v2366_v45 = vld [vmem:[#allocation3 + $0xd0] sm:$0xff] }
 0x44d   :  { %1519 = vtanh.f32 %v865_v47  ;;  %v2372_v47 = vld [vmem:[#allocation3 + $0xb8] sm:$0xff] }
 0x456   :  { %v1514_v48 = vpop.eup %1513 }
 0x457   :  { %v870_v49 = vmul.f32 0.5, %v1514_v48  ;;  %v2375_v48 = vld [vmem:[#allocation3 + $0xa0] sm:$0xff] }
 0x458   :  { %v1516_v50 = vpop.eup %1515 }
 0x459   :  { %v873_v51 = vadd.f32 0.5, %v870_v49  ;;  %v871_v52 = vmul.f32 0.5, %v1516_v50  ;;  %v1518_v62 = vpop.eup %1517  ;;  %v2378_v49 = vld [vmem:[#allocation3 + $0xb0] sm:$0xff]  ;;  %v2381_v50 = vld [vmem:[#allocation3 + $0x88] sm:$0xff] }
 0x45a   :  { %v1520_v13 = vpop.eup %1519  ;;  %2719 = vst [vmem:[#allocation9_spill] sm:$0xff] %v2381_v50 }
 0x45b   :  { %v874_v53 = vadd.f32 0.5, %v871_v52  ;;  %v881_v55 = vmul.f32 %v1518_v62, %v873_v51  ;;  %v872_v61 = vmul.f32 0.5, %v1520_v13  ;;  %v2384_v51 = vld [vmem:[#allocation3 + $0x98] sm:$0xff]  ;;  %v2387_v52 = vld [vmem:[#allocation3 + $0x80] sm:$0xff]  ;;  %v2405_v13 = vld [vmem:[#allocation3 + $0x48] sm:$0xff] }
 0x45c   :  { %2720 = vst [vmem:[#allocation10_spill] sm:$0xff] %v2384_v51  ;;  %2721 = vst [vmem:[#allocation11_spill] sm:$0xff] %v2387_v52  ;;  %v2396_v62 = vld [vmem:[#allocation3 + $0x78] sm:$0xff] }
 0x45d   :  { %v880_v3 = vmul.f32 %v878_v54, %v874_v53  ;;  %v875_v1 = vadd.f32 0.5, %v872_v61  ;;  %v2390_v53 = vld [vmem:[#allocation3 + $0x90] sm:$0xff]  ;;  %v2393_v54 = vld [vmem:[#allocation3 + $0x68] sm:$0xff]  ;;  %2724 = vst [vmem:[#allocation14_spill] sm:$0xff] %v2396_v62  ;;  %2727 = vst [vmem:[#allocation17_spill] sm:$0xff] %v2405_v13 }
 0x45e   :  { %2722 = vst [vmem:[#allocation12_spill] sm:$0xff] %v2390_v53  ;;  %2723 = vst [vmem:[#allocation13_spill] sm:$0xff] %v2393_v54  ;;  %v2408_v61 = vld [vmem:[#allocation3 + $0x58] sm:$0xff] }
 0x45f   :  { %v2252_v56 = vadd.f32 %v881_v55, %v880_v3  ;;  %v2399_v3 = vld [vmem:[#allocation3 + $0x60] sm:$0xff]  ;;  %v2402_v55 = vld [vmem:[#allocation3 + $0x70] sm:$0xff]  ;;  %2728 = vst [vmem:[#allocation18_spill] sm:$0xff] %v2408_v61 }
 0x460   :  { %2725 = vst [vmem:[#allocation15_spill] sm:$0xff] %v2399_v3  ;;  %2726 = vst [vmem:[#allocation16_spill] sm:$0xff] %v2402_v55 }
 0x461   :  { %1521 = vtanh.f32 %v2252_v56 }
 0x46e   :  { %v1522_v6 = vpop.eup %1521 }
 0x46f   :  { %v884_v2 = vmul.f32 %v1522_v6, %v875_v1  ;;  %v2411_v1 = vld [vmem:[#allocation3 + $0x40] sm:$0xff]  ;;  %v2414_v6 = vld [vmem:[#allocation3 + $0x50] sm:$0xff] }
 0x470   :  { %2729 = vst [vmem:[#allocation19_spill] sm:$0xff] %v2411_v1  ;;  %2730 = vst [vmem:[#allocation20_spill] sm:$0xff] %v2414_v6 }
 0x471   :  { %v886_v9 = vrot.slane %v884_v2, 4  ;;  %v2417_v2 = vld [vmem:[#allocation3 + $0x28] sm:$0xff] }
 0x472   :  { %2731 = vst [vmem:[#allocation21_spill] sm:$0xff] %v2417_v2 }
 0x473   :  { %953 = vmatmul.mubr.f32.vlgmr.msra.gmra.mxu0 %v886_v9  ;;  %1024 = vmatmul.mubr.f32.vlgmr.msra.gmra.mxu1 %v886_v9  ;;  %v2420_v9 = vld [vmem:[#allocation3 + $0x38] sm:$0xff] }
 0x474   :  { %1068 = vmatpush1.msra.mxu0 %v2255_v5  ;;  %1139 = vmatpush1.msra.mxu1 %v2258_v59  ;;  %2732 = vst [vmem:[#allocation22_spill] sm:$0xff] %v2420_v9 }
 0x475   :  { %1069 = vmatprep.subr.mxu0 %v2261_v58  ;;  %1140 = vmatprep.subr.mxu1 %v2264_v7 }
 0x476   :  { %1070 = vmatpush1.msra.mxu0 %v2267_v63  ;;  %1141 = vmatpush1.msra.mxu1 %v2270_v10 }
 0x477   :  { %1071 = vmatprep.subr.mxu0 %v2273_v4  ;;  %1142 = vmatprep.subr.mxu1 %v2276_v60 }
 0x478   :  { %1072 = vmatpush1.msra.mxu0 %v2279_v12  ;;  %1143 = vmatpush1.msra.mxu1 %v2282_v14 }
 0x479   :  { %1073 = vmatprep.subr.mxu0 %v2285_v15  ;;  %1144 = vmatprep.subr.mxu1 %v2288_v16 }
 0x47a   :  { %1074 = vmatpush1.msra.mxu0 %v2291_v17  ;;  %1145 = vmatpush1.msra.mxu1 %v2294_v18 }
 0x47b   :  { %1075 = vmatprep.subr.mxu0 %v2297_v19  ;;  %1146 = vmatprep.subr.mxu1 %v2300_v20 }
 0x47c   :  { %1076 = vmatpush1.msra.mxu0 %v2303_v21  ;;  %1147 = vmatpush1.msra.mxu1 %v2306_v22 }
 0x47d   :  { %1077 = vmatprep.subr.mxu0 %v2309_v23  ;;  %1148 = vmatprep.subr.mxu1 %v2312_v24 }
 0x47e   :  { %1078 = vmatpush1.msra.mxu0 %v2315_v25  ;;  %1149 = vmatpush1.msra.mxu1 %v2318_v26 }
 0x47f   :  { %1079 = vmatprep.subr.mxu0 %v2321_v27  ;;  %1150 = vmatprep.subr.mxu1 %v2324_v28 }
 0x480   :  { %1080 = vmatpush1.msra.mxu0 %v2327_v29  ;;  %1151 = vmatpush1.msra.mxu1 %v2330_v30 }
 0x481   :  { %1081 = vmatprep.subr.mxu0 %v2333_v31  ;;  %1152 = vmatprep.subr.mxu1 %v2336_v33 }
 0x482   :  { %1082 = vmatpush1.msra.mxu0 %v2339_v36  ;;  %1153 = vmatpush1.msra.mxu1 %v2342_v37 }
 0x483   :  { %1083 = vmatprep.subr.mxu0 %v2345_v38  ;;  %1154 = vmatprep.subr.mxu1 %v2348_v39 }
 0x484   :  { %1084 = vmatpush1.msra.mxu0 %v2351_v40  ;;  %1155 = vmatpush1.msra.mxu1 %v2354_v41 }
 0x485   :  { %1085 = vmatprep.subr.mxu0 %v2357_v42  ;;  %1156 = vmatprep.subr.mxu1 %v2360_v43 }
 0x486   :  { %1086 = vmatpush1.msra.mxu0 %v2363_v44  ;;  %1157 = vmatpush1.msra.mxu1 %v2366_v45 }
 0x487   :  { %1087 = vmatprep.subr.mxu0 %v2369_v46  ;;  %1158 = vmatprep.subr.mxu1 %v2372_v47 }
 0x488   :  { %1088 = vmatpush1.msra.mxu0 %v2375_v48  ;;  %1159 = vmatpush1.msra.mxu1 %v2378_v49 }
 0x489   :  { %1089 = vmatprep.subr.mxu0 %v2381_v50  ;;  %1160 = vmatprep.subr.mxu1 %v2384_v51 }
 0x48a   :  { %1090 = vmatpush1.msra.mxu0 %v2387_v52  ;;  %1161 = vmatpush1.msra.mxu1 %v2390_v53 }
 0x48b   :  { %1091 = vmatprep.subr.mxu0 %v2393_v54  ;;  %1162 = vmatprep.subr.mxu1 %v2396_v62 }
 0x48c   :  { %1092 = vmatpush1.msra.mxu0 %v2399_v3  ;;  %1163 = vmatpush1.msra.mxu1 %v2402_v55 }
 0x48d   :  { %1093 = vmatprep.subr.mxu0 %v2405_v13  ;;  %1164 = vmatprep.subr.mxu1 %v2408_v61  ;;  %v2423_v13 = vld [vmem:[#allocation3 + $0x20] sm:$0xff]  ;;  %v2426_v61 = vld [vmem:[#allocation3 + $0x30] sm:$0xff] }
 0x48e   :  { %1094 = vmatpush1.msra.mxu0 %v2411_v1  ;;  %1165 = vmatpush1.msra.mxu1 %v2414_v6  ;;  %2733 = vst [vmem:[#allocation23_spill] sm:$0xff] %v2423_v13  ;;  %2734 = vst [vmem:[#allocation24_spill] sm:$0xff] %v2426_v61  ;;  %v2429_v1 = vld [vmem:[#allocation3 + $0x8] sm:$0xff]  ;;  %v2432_v6 = vld [vmem:[#allocation3 + $0x18] sm:$0xff] }
 0x48f   :  { %1095 = vmatprep.subr.mxu0 %v2417_v2  ;;  %1166 = vmatprep.subr.mxu1 %v2420_v9  ;;  %2735 = vst [vmem:[#allocation25_spill] sm:$0xff] %v2429_v1  ;;  %2736 = vst [vmem:[#allocation26_spill] sm:$0xff] %v2432_v6  ;;  %v2435_v2 = vld [vmem:[#allocation3] sm:$0xff]  ;;  %v2439_v9 = vld [vmem:[#allocation3 + $0x10] sm:$0xff] }
 0x490   :  { %1096 = vmatpush1.msra.mxu0 %v2423_v13  ;;  %1167 = vmatpush1.msra.mxu1 %v2426_v61  ;;  %2737 = vst [vmem:[#allocation27_spill] sm:$0xff] %v2435_v2  ;;  %2738 = vst [vmem:[#allocation28_spill] sm:$0xff] %v2439_v9 }
 0x491   :  { %1097 = vmatprep.subr.mxu0 %v2429_v1  ;;  %1168 = vmatprep.subr.mxu1 %v2432_v6 }
 0x492   :  { %1098 = vmatpush1.msra.mxu0 %v2435_v2  ;;  %1131 = vmatprep.mubr.f32.mxu0 %v2717_v32 }
 0x493   :  { %1169 = vmatpush1.msra.mxu1 %v2439_v9  ;;  %1202 = vmatprep.mubr.f32.mxu1 %v2717_v32 }
 0x494   :  { %1246 = vmatprep.subr.mxu0 %v2241_v34  ;;  %1317 = vmatprep.subr.mxu1 %v2244_v35 }
 0x533   :  { %v954_v1 = vpop.f32.mrf.mxu0  ;;  %v1025_v61 = vpop.f32.mrf.mxu1 }
 0x534   :  { %v1034_v13 = vrot.slane %v954_v1, 3  ;;  %v1036_v32 = vrot.slane %v1025_v61, 3 }
 0x535   :  { %v956_v6 = vpop.f32.mrf.mxu0  ;;  %v1027_v55 = vpop.f32.mrf.mxu1 }
 0x536   :  { %v1042_v3 = vadd.f32 %v1034_v13, %v1938_v11  ;;  %v1035_v2 = vrot.slane %v956_v6, 3  ;;  %v1037_v62 = vrot.slane %v1027_v55, 3  ;;  %v1044_v34 = vadd.f32 %v1036_v32, %v1949_v8 }
 0x537   :  { %v1057_v13 = vrot.slane %v2252_v56, 7  ;;  %v2739_v56 = vld [vmem:[#allocation9_spill] sm:$0xff] }
 0x538   :  { %1523 = vtanh.f32 %v1042_v3  ;;  %v1043_v54 = vadd.f32 %v1035_v2, %v1941_v0  ;;  %v1045_v9 = vadd.f32 %v1037_v62, %v1944_v57 }
 0x53a   :  { %1525 = vtanh.f32 %v1043_v54 }
 0x53b   :  { %1527 = vtanh.f32 %v1045_v9 }
 0x53c   :  { %1529 = vtanh.f32 %v1044_v34 }
 0x545   :  { %v1524_v35 = vpop.eup %1523 }
 0x546   :  { %v1049_v53 = vmul.f32 0.5, %v1524_v35 }
 0x547   :  { %v1526_v52 = vpop.eup %1525 }
 0x548   :  { %v1052_v1 = vadd.f32 0.5, %v1049_v53  ;;  %v1050_v51 = vmul.f32 0.5, %v1526_v52  ;;  %v1528_v55 = vpop.eup %1527 }
 0x549   :  { %v1530_v54 = vpop.eup %1529 }
 0x54a   :  { %v1053_v50 = vadd.f32 0.5, %v1050_v51  ;;  %v1060_v6 = vmul.f32 %v1528_v55, %v1052_v1  ;;  %v1051_v62 = vmul.f32 0.5, %v1530_v54 }
 0x54c   :  { %v1059_v3 = vmul.f32 %v1057_v13, %v1053_v50  ;;  %v1054_v61 = vadd.f32 0.5, %v1051_v62 }
 0x54e   :  { %v2450_v2 = vadd.f32 %v1060_v6, %v1059_v3 }
 0x550   :  { %1531 = vtanh.f32 %v2450_v2 }
 0x55d   :  { %v1532_v32 = vpop.eup %1531 }
 0x55e   :  { %v1063_v9 = vmul.f32 %v1532_v32, %v1054_v61 }
 0x560   :  { %v1065_v35 = vrot.slane %v1063_v9, 5 }
 0x562   :  { %1132 = vmatmul.mubr.f32.vlgmr.msra.gmra.mxu0 %v1065_v35  ;;  %1203 = vmatmul.mubr.f32.vlgmr.msra.gmra.mxu1 %v1065_v35 }
 0x563   :  { %1247 = vmatpush1.msra.mxu0 %v2255_v5  ;;  %1318 = vmatpush1.msra.mxu1 %v2258_v59  ;;  %v2740_v5 = vld [vmem:[#allocation10_spill] sm:$0xff]  ;;  %v2741_v59 = vld [vmem:[#allocation11_spill] sm:$0xff] }
 0x564   :  { %1248 = vmatprep.subr.mxu0 %v2261_v58  ;;  %1319 = vmatprep.subr.mxu1 %v2264_v7  ;;  %v2742_v58 = vld [vmem:[#allocation12_spill] sm:$0xff]  ;;  %v2743_v7 = vld [vmem:[#allocation13_spill] sm:$0xff] }
 0x565   :  { %1249 = vmatpush1.msra.mxu0 %v2267_v63  ;;  %1320 = vmatpush1.msra.mxu1 %v2270_v10  ;;  %v2744_v63 = vld [vmem:[#allocation14_spill] sm:$0xff]  ;;  %v2745_v10 = vld [vmem:[#allocation15_spill] sm:$0xff] }
 0x566   :  { %1250 = vmatprep.subr.mxu0 %v2273_v4  ;;  %1321 = vmatprep.subr.mxu1 %v2276_v60  ;;  %v2746_v4 = vld [vmem:[#allocation16_spill] sm:$0xff]  ;;  %v2747_v60 = vld [vmem:[#allocation17_spill] sm:$0xff] }
 0x567   :  { %1251 = vmatpush1.msra.mxu0 %v2279_v12  ;;  %1322 = vmatpush1.msra.mxu1 %v2282_v14  ;;  %v2748_v12 = vld [vmem:[#allocation18_spill] sm:$0xff]  ;;  %v2749_v14 = vld [vmem:[#allocation19_spill] sm:$0xff] }
 0x568   :  { %1252 = vmatprep.subr.mxu0 %v2285_v15  ;;  %1323 = vmatprep.subr.mxu1 %v2288_v16  ;;  %v2750_v15 = vld [vmem:[#allocation20_spill] sm:$0xff]  ;;  %v2751_v16 = vld [vmem:[#allocation21_spill] sm:$0xff] }
 0x569   :  { %1253 = vmatpush1.msra.mxu0 %v2291_v17  ;;  %1324 = vmatpush1.msra.mxu1 %v2294_v18  ;;  %v2752_v17 = vld [vmem:[#allocation22_spill] sm:$0xff]  ;;  %v2753_v18 = vld [vmem:[#allocation23_spill] sm:$0xff] }
 0x56a   :  { %1254 = vmatprep.subr.mxu0 %v2297_v19  ;;  %1325 = vmatprep.subr.mxu1 %v2300_v20  ;;  %v2754_v19 = vld [vmem:[#allocation24_spill] sm:$0xff]  ;;  %v2755_v20 = vld [vmem:[#allocation25_spill] sm:$0xff] }
 0x56b   :  { %1255 = vmatpush1.msra.mxu0 %v2303_v21  ;;  %1326 = vmatpush1.msra.mxu1 %v2306_v22  ;;  %v2756_v21 = vld [vmem:[#allocation26_spill] sm:$0xff]  ;;  %v2757_v22 = vld [vmem:[#allocation27_spill] sm:$0xff] }
 0x56c   :  { %1256 = vmatprep.subr.mxu0 %v2309_v23  ;;  %1327 = vmatprep.subr.mxu1 %v2312_v24  ;;  %v2758_v23 = vmov 0.0   ;;  %v2759_v24 = vld [vmem:[#allocation28_spill] sm:$0xff] }
 0x56d   :  { %1257 = vmatpush1.msra.mxu0 %v2315_v25  ;;  %1328 = vmatpush1.msra.mxu1 %v2318_v26 }
 0x56e   :  { %1258 = vmatprep.subr.mxu0 %v2321_v27  ;;  %1329 = vmatprep.subr.mxu1 %v2324_v28 }
 0x56f   :  { %1259 = vmatpush1.msra.mxu0 %v2327_v29  ;;  %1330 = vmatpush1.msra.mxu1 %v2330_v30 }
 0x570   :  { %1260 = vmatprep.subr.mxu0 %v2333_v31  ;;  %1331 = vmatprep.subr.mxu1 %v2336_v33 }
 0x571   :  { %1261 = vmatpush1.msra.mxu0 %v2339_v36  ;;  %1332 = vmatpush1.msra.mxu1 %v2342_v37 }
 0x572   :  { %1262 = vmatprep.subr.mxu0 %v2345_v38  ;;  %1333 = vmatprep.subr.mxu1 %v2348_v39 }
 0x573   :  { %1263 = vmatpush1.msra.mxu0 %v2351_v40  ;;  %1334 = vmatpush1.msra.mxu1 %v2354_v41 }
 0x574   :  { %1264 = vmatprep.subr.mxu0 %v2357_v42  ;;  %1335 = vmatprep.subr.mxu1 %v2360_v43 }
 0x575   :  { %1265 = vmatpush1.msra.mxu0 %v2363_v44  ;;  %1336 = vmatpush1.msra.mxu1 %v2366_v45 }
 0x576   :  { %1266 = vmatprep.subr.mxu0 %v2369_v46  ;;  %1337 = vmatprep.subr.mxu1 %v2372_v47  ;;  %v1236_v46 = vrot.slane %v2450_v2, 7 }
 0x577   :  { %1267 = vmatpush1.msra.mxu0 %v2375_v48  ;;  %1338 = vmatpush1.msra.mxu1 %v2378_v49 }
 0x578   :  { %1268 = vmatprep.subr.mxu0 %v2739_v56  ;;  %1339 = vmatprep.subr.mxu1 %v2740_v5 }
 0x579   :  { %1269 = vmatpush1.msra.mxu0 %v2741_v59  ;;  %1340 = vmatpush1.msra.mxu1 %v2742_v58 }
 0x57a   :  { %1270 = vmatprep.subr.mxu0 %v2743_v7  ;;  %1341 = vmatprep.subr.mxu1 %v2744_v63 }
 0x57b   :  { %1271 = vmatpush1.msra.mxu0 %v2745_v10  ;;  %1342 = vmatpush1.msra.mxu1 %v2746_v4 }
 0x57c   :  { %1272 = vmatprep.subr.mxu0 %v2747_v60  ;;  %1343 = vmatprep.subr.mxu1 %v2748_v12 }
 0x57d   :  { %1273 = vmatpush1.msra.mxu0 %v2749_v14  ;;  %1344 = vmatpush1.msra.mxu1 %v2750_v15 }
 0x57e   :  { %1274 = vmatprep.subr.mxu0 %v2751_v16  ;;  %1345 = vmatprep.subr.mxu1 %v2752_v17 }
 0x57f   :  { %1275 = vmatpush1.msra.mxu0 %v2753_v18  ;;  %1346 = vmatpush1.msra.mxu1 %v2754_v19 }
 0x580   :  { %1276 = vmatprep.subr.mxu0 %v2755_v20  ;;  %1347 = vmatprep.subr.mxu1 %v2756_v21  ;;  %v1466_v21 = vld [vmem:[#allocation2] ss:$0 sm:$0xff] }
 0x581   :  { %1277 = vmatpush1.msra.mxu0 %v2757_v22  ;;  %1310 = vmatprep.mubr.f32.mxu0 %v2758_v23 }
 0x582   :  { %1348 = vmatpush1.msra.mxu1 %v2759_v24  ;;  %1381 = vmatprep.mubr.f32.mxu1 %v2758_v23 }
 0x622   :  { %v1133_v25 = vpop.f32.mrf.mxu0  ;;  %v1204_v26 = vpop.f32.mrf.mxu1 }
 0x623   :  { %v1213_v27 = vrot.slane %v1133_v25, 2  ;;  %v1215_v38 = vrot.slane %v1204_v26, 2 }
 0x624   :  { %v1135_v28 = vpop.f32.mrf.mxu0  ;;  %v1206_v29 = vpop.f32.mrf.mxu1 }
 0x625   :  { %v1221_v30 = vadd.f32 %v1213_v27, %v1938_v11  ;;  %v1214_v31 = vrot.slane %v1135_v28, 2  ;;  %v1216_v33 = vrot.slane %v1206_v29, 2  ;;  %v1223_v39 = vadd.f32 %v1215_v38, %v1949_v8 }
 0x627   :  { %1533 = vtanh.f32 %v1221_v30  ;;  %v1222_v36 = vadd.f32 %v1214_v31, %v1941_v0  ;;  %v1224_v37 = vadd.f32 %v1216_v33, %v1944_v57 }
 0x629   :  { %1535 = vtanh.f32 %v1222_v36 }
 0x62a   :  { %1537 = vtanh.f32 %v1224_v37 }
 0x62b   :  { %1539 = vtanh.f32 %v1223_v39 }
 0x634   :  { %v1534_v40 = vpop.eup %1533 }
 0x635   :  { %v1228_v41 = vmul.f32 0.5, %v1534_v40 }
 0x636   :  { %v1536_v42 = vpop.eup %1535 }
 0x637   :  { %v1231_v43 = vadd.f32 0.5, %v1228_v41  ;;  %v1229_v44 = vmul.f32 0.5, %v1536_v42  ;;  %v1538_v47 = vpop.eup %1537 }
 0x638   :  { %v1540_v51 = vpop.eup %1539 }
 0x639   :  { %v1232_v45 = vadd.f32 0.5, %v1229_v44  ;;  %v1239_v49 = vmul.f32 %v1538_v47, %v1231_v43  ;;  %v1230_v52 = vmul.f32 0.5, %v1540_v51 }
 0x63b   :  { %v1238_v48 = vmul.f32 %v1236_v46, %v1232_v45  ;;  %v1233_v53 = vadd.f32 0.5, %v1230_v52 }
 0x63d   :  { %v1240_v50 = vadd.f32 %v1239_v49, %v1238_v48 }
 0x63f   :  { %1541 = vtanh.f32 %v1240_v50 }
 0x64c   :  { %v1542_v34 = vpop.eup %1541 }
 0x64d   :  { %v1242_v1 = vmul.f32 %v1542_v34, %v1233_v53 }
 0x64f   :  { %v1244_v13 = vrot.slane %v1242_v1, 6 }
 0x651   :  { %1311 = vmatmul.mubr.f32.vlgmr.msra.gmra.mxu0 %v1244_v13  ;;  %1382 = vmatmul.mubr.f32.vlgmr.msra.gmra.mxu1 %v1244_v13 }
 0x711   :  { %v1312_v55 = vpop.f32.mrf.mxu0  ;;  %v1383_v3 = vpop.f32.mrf.mxu1 }
 0x712   :  { %v1392_v6 = vrot.slane %v1312_v55, 1  ;;  %v1394_v56 = vrot.slane %v1383_v3, 1 }
 0x713   :  { %v1314_v54 = vpop.f32.mrf.mxu0  ;;  %v1385_v62 = vpop.f32.mrf.mxu1 }
 0x714   :  { %v1400_v2 = vadd.f32 %v1392_v6, %v1938_v11  ;;  %v1393_v61 = vrot.slane %v1314_v54, 1  ;;  %v1395_v32 = vrot.slane %v1385_v62, 1  ;;  %v1402_v5 = vadd.f32 %v1394_v56, %v1949_v8  ;;  %v1465_v8 = vld [vmem:[%s2536_s4] ss:$0 sm:$0xff]  ;;  %s1641_s4 = scalar_lea.vmem %s1457_s10, 16 }
 0x715   :  { %v1415_v11 = vrot.slane %v1240_v50, 7  ;;  %p1642_p5 = scmp.ne.s32.totalorder %s1457_s10, %s1641_s4  ;;  %p1647_p7 = scmp.lt.s32.totalorder %s1645_s11, %s1641_s4 }
 0x716   :  { %1543 = vtanh.f32 %v1400_v2  ;;  %v1401_v9 = vadd.f32 %v1393_v61, %v1941_v0  ;;  %v1403_v35 = vadd.f32 %v1395_v32, %v1944_v57 }
 0x717   :  { %p1648_p8 = por %p1647_p7, %p1646_p6 }
 0x718   :  { %1545 = vtanh.f32 %v1401_v9 }
 0x719   :  { %1547 = vtanh.f32 %v1403_v35  ;;  %p1649_p9 = pnand %p1648_p8, %p1642_p5 }
 0x71a   :  { %1549 = vtanh.f32 %v1402_v5 }
 0x723   :  { %v1544_v59 = vpop.eup %1543 }
 0x724   :  { %v1407_v58 = vmul.f32 0.5, %v1544_v59 }
 0x725   :  { %v1546_v7 = vpop.eup %1545 }
 0x726   :  { %v1410_v63 = vadd.f32 0.5, %v1407_v58  ;;  %v1408_v10 = vmul.f32 0.5, %v1546_v7  ;;  %v1548_v60 = vpop.eup %1547 }
 0x727   :  { %v1550_v0 = vpop.eup %1549 }
 0x728   :  { %v1411_v4 = vadd.f32 0.5, %v1408_v10  ;;  %v1418_v14 = vmul.f32 %v1548_v60, %v1410_v63  ;;  %v1409_v16 = vmul.f32 0.5, %v1550_v0 }
 0x72a   :  { %v1417_v12 = vmul.f32 %v1415_v11, %v1411_v4  ;;  %v1412_v57 = vadd.f32 0.5, %v1409_v16 }
 0x72c   :  { %v1419_v15 = vadd.f32 %v1418_v14, %v1417_v12 }
 0x72e   :  { %1551 = vtanh.f32 %v1419_v15 }
 0x73b   :  { %v1552_v17 = vpop.eup %1551 }
 0x73c   :  { %v1421_v18 = vmul.f32 %v1552_v17, %v1412_v57 }
 0x73e   :  { %v1429_v19 = vmul.f32 %v1465_v8, %v1421_v18 }
 0x740   :  { %v1431_v20 = vsel %vm1430_vm0, %v1429_v19, 0.0 }
 0x741   :  { %1432 = vadd.xlane.f32.xlu0 %v1431_v20 }
 0x7ca   :  { %v1433_v22 = vpop.xlane.xlu0 %1432 }
 0x7cb   :  { %v1441_v23 = vadd.f32 %v1466_v21, %v1433_v22 }
 0x7cd   :  { %v1467_v24 = vmul.f32 -1.442695, %v1441_v23 }
 0x7cf   :  { %1553 = vpow2.f32 %v1467_v24 }
 0x7dc   :  { %v1554_v25 = vpop.eup %1553 }
 0x7dd   :  { %v1445_v26 = vadd.f32 1.0, %v1554_v25 }
 0x7df   :  { %1555 = vrcp.f32 %v1445_v26 }
 0x7ec   :  { %v1556_v27 = vpop.eup %1555 }
 0x7ed   :  { %1449 = vst.msk [vmem:[#allocation6 - $0x7] sm:$0x80] %vm1448_vm1, %v1556_v27 }
 0x7ee   :  { %1652 = shalt.err (!%p1649_p9)
}
 0x7ef   :  { %1459 = dma.vmem_to_hbm [thread:$0]  %s1457_s10, 16, %s2538_s6, [#allocation5]  }
 0x7f0   :  { %1663 = dma.done.wait [#allocation5], 16  }
 0x7f1   :  { %1664 = vsyncadd [#allocation5], 4294967280 }
 0x7f2   :  { %1463 = vsyncpa [#allocation4], 1 }
 0x7f3   :  { %1464 = vsyncpa [#allocation5], 1 }

</bundles_post_ra>
